<compile_context>
chip_gen: v6e
topology: v6e:2x2x1
jax: 0.10.0
libtpu: 0.0.40
codegen_flags: <defaults>
</compile_context>

<pallas_src>
import functools

import jax
import jax.numpy as jnp
from jax import lax
from jax.experimental import pallas as pl
from jax.experimental.pallas import tpu as pltpu

D = 10          # embedding dim (from the PyTorch script)
N = 4           # context half-width (from the PyTorch script)

LANE = 128
BATCH_TILE = 128


def _round_up(x, m):
    return (x + m - 1) // m * m


def cbow_kernel(idx_ref, w1t_ref, b1_ref, w2t_ref, b2_ref, out_ref, *, v):
    """One batch tile.

    idx (TB, 2N) i32 | w1t (Vp, Dp) | b1 (1, Dp) | w2t (Dp, Vp) | b2 (1, Vp)
    -> out (TB, Vp) f32 log-probabilities (padded vocab lanes are junk, sliced
    off by the wrapper).
    """
    tb, two_n = idx_ref.shape
    vp = w1t_ref.shape[0]

    idx = idx_ref[...]                                           # (TB, 2N) i32
    vocab_iota = lax.broadcasted_iota(jnp.int32, (tb, vp), 1)    # (TB, Vp)

    # Embedding gather as a one-hot count matrix -> MXU matmul (no scalar loop,
    # no data-dependent VMEM addressing).
    counts = jnp.zeros((tb, vp), jnp.float32)
    for j in range(two_n):                                       # static unroll
        idx_col = idx[:, j:j + 1]                                # (TB, 1)
        counts = counts + (vocab_iota == idx_col).astype(jnp.float32)

    # sum_i w1.weight[:, idx_i] == counts @ w1t ; then mean + bias.
    emb = jnp.dot(counts, w1t_ref[...], preferred_element_type=jnp.float32)
    emb = emb * (1.0 / two_n) + b1_ref[...]                      # (TB, Dp)

    # linear2
    logits = jnp.dot(emb, w2t_ref[...], preferred_element_type=jnp.float32)
    logits = logits + b2_ref[...]                                # (TB, Vp)

    # Mask padded vocab lanes so they do not perturb the log-softmax.
    logits = jnp.where(vocab_iota < v, logits, -1e30)

    m = jnp.max(logits, axis=1, keepdims=True)
    lse = m + jnp.log(jnp.sum(jnp.exp(logits - m), axis=1, keepdims=True))
    out_ref[...] = logits - lse


def prepare_params(w1, b1, w2, b2, *, lane=LANE):
    """One-time host-side layout prep (hoisted out of the hot path):
    transpose to kernel layout and zero-pad D -> Dp=128, V -> Vp=round_up(V,128)."""
    d, v = w1.shape
    dp = max(lane, _round_up(d, lane))
    vp = _round_up(v, lane)
    w1t_p = jnp.zeros((vp, dp), jnp.float32).at[:v, :d].set(w1.T)
    b1_p = jnp.zeros((1, dp), jnp.float32).at[0, :d].set(b1)
    w2t_p = jnp.zeros((dp, vp), jnp.float32).at[:d, :v].set(w2.T)
    b2_p = jnp.zeros((1, vp), jnp.float32).at[0, :v].set(b2)
    return w1t_p, b1_p, w2t_p, b2_p


@functools.partial(jax.jit, static_argnames=("v", "tb"))
def cbow_forward(idx, w1t_p, b1_p, w2t_p, b2_p, *, v, tb=BATCH_TILE):
    """idx: (B, 2N) int word ids; params in kernel layout (see prepare_params).
    Returns (B, V) f32 log-probabilities (one CBOW forward per row)."""
    b, two_n = idx.shape
    vp, dp = w1t_p.shape
    b_pad = _round_up(max(b, tb), tb)

    # Pad batch to a multiple of the tile; pad rows use id 0 and are sliced off.
    idx_p = jnp.zeros((b_pad, two_n), jnp.int32).at[:b].set(idx.astype(jnp.int32))

    grid = (b_pad // tb,)
    out = pl.pallas_call(
        functools.partial(cbow_kernel, v=v),
        out_shape=jax.ShapeDtypeStruct((b_pad, vp), jnp.float32),
        grid=grid,
        in_specs=[
            pl.BlockSpec((tb, two_n), lambda i: (i, 0)),   # context ids (batch-tiled)
            pl.BlockSpec((vp, dp), lambda i: (0, 0)),      # w1t (VMEM resident)
            pl.BlockSpec((1, dp), lambda i: (0, 0)),       # b1
            pl.BlockSpec((dp, vp), lambda i: (0, 0)),      # w2t (VMEM resident)
            pl.BlockSpec((1, vp), lambda i: (0, 0)),       # b2
        ],
        out_specs=pl.BlockSpec((tb, vp), lambda i: (i, 0)),
        compiler_params=pltpu.CompilerParams(
            dimension_semantics=("parallel",)),            # v7x: split batch on 2 TCs
    )(idx_p, w1t_p, b1_p, w2t_p, b2_p)
    return out[:b, :v]


if __name__ == "__main__":
    text = (
        "Bismillahir Rahmanir Raheem\n"
        "Conquering the Physics GRE represents the combined efforts\n"
        "of two MIT graduate students frustrated with the lack of\n"
        "decent preparation materials for the Physics GRE subject test.\n"
        "When we took the exams, in 2007 and 2009, we did what\n"
        "any student in the internet age would do \u2013 searched the various\n"
        "online bookstores for \u201cphysics GRE prep,\u201d \u201cphysics GRE\n"
        "practice tests,\u201d and so on. We were puzzled when the only\n"
        "results were physics practice problems that had nothing to\n"
        "do with the GRE specifically or, worse, GRE practice books\n"
        "having nothing to do with physics. Undeterred, we headed\n"
        "to our local brick-and-mortar bookstores, where we found\n"
        "a similar situation. There were practice books for every single GRE subject\n"
        "exam, except physics. Further web searches\n"
        "unearthed www.grephysics.net, containing every problem\n"
        "and solution from every practice test released up to that point,\n"
        "and www.physicsgre.com, a web forum devoted to discussing\n"
        "problems and strategies for the test. We discovered these sites\n"
        "had sprung up thanks to other frustrated physicists just like\n"
        "us: there was no review material available, so students did the\n"
        "best they could with the meager material that did exist. This\n"
        "situation is particularly acute for students in smaller departments, who\n"
        "have fewer classmates with whom to study and\n"
        "share the \u201cwar stories\u201d of the GRE"
    )

    text_words = text.split()
    corpus = sorted(set(text_words))
    V = len(corpus)
    corpus_with_idx = {w: i for i, w in enumerate(corpus)}

    # Build all CBOW contexts (N words on each side of every center word).
    context_list = []
    for i in range(N, len(text_words) - N):
        ctx = text_words[i - N:i] + text_words[i + 1:i + N + 1]
        context_list.append([corpus_with_idx[w] for w in ctx])
    idx = jnp.array(context_list, dtype=jnp.int32)          # (B, 2N)
    B = idx.shape[0]

    # Deterministic synthetic parameters (PyTorch nn.Linear shapes).
    key = jax.random.PRNGKey(0)
    k1, k2, k3, k4 = jax.random.split(key, 4)
    w1 = jax.random.normal(k1, (D, V), jnp.float32) * 0.1    # linear1.weight
    b1 = jax.random.normal(k2, (D,), jnp.float32) * 0.1      # linear1.bias
    w2 = jax.random.normal(k3, (V, D), jnp.float32) * 0.1    # linear2.weight
    b2 = jax.random.normal(k4, (V,), jnp.float32) * 0.1      # linear2.bias

    # One-time layout prep (transpose + pad), kept out of the per-call path.
    w1t_p, b1_p, w2t_p, b2_p = prepare_params(w1, b1, w2, b2)

    # Batched forward over every context in the corpus.
    out = cbow_forward(idx, w1t_p, b1_p, w2t_p, b2_p, v=V, tb=BATCH_TILE)
    out = jax.block_until_ready(out)

    # Pure-JAX reference (mirrors the PyTorch forward exactly).
    cols = w1[:, idx]                                        # (D, B, 2N)
    emb_ref = jnp.mean(cols, axis=2).T + b1[None, :]         # (B, D)
    logits_ref = emb_ref @ w2.T + b2[None, :]                # (B, V)
    ref = jax.nn.log_softmax(logits_ref, axis=1)

    assert out.shape == (B, V) and out.dtype == jnp.float32
    assert jnp.allclose(out, ref, atol=5e-4, rtol=5e-4)

    # Single-example path from the original script: my_idx = 18, inp (1, 2N).
    my_idx = 18
    single = cbow_forward(idx[my_idx:my_idx + 1], w1t_p, b1_p, w2t_p, b2_p,
                          v=V, tb=BATCH_TILE)
    single = jax.block_until_ready(single)
    assert single.shape == (1, V)
    assert jnp.allclose(single, ref[my_idx:my_idx + 1], atol=5e-4, rtol=5e-4)

    print("KERNEL_OK")
</pallas_src>

<mosaic_0001>
module attributes {stable_mosaic.version = 11 : i64} {
  func.func @cbow_kernel(%arg0: i32, %arg1: memref<128x8xi32, #tpu.memory_space<vmem>>, %arg2: memref<256x128xf32, #tpu.memory_space<vmem>>, %arg3: memref<1x128xf32, #tpu.memory_space<vmem>>, %arg4: memref<128x256xf32, #tpu.memory_space<vmem>>, %arg5: memref<1x256xf32, #tpu.memory_space<vmem>>, %arg6: memref<128x256xf32, #tpu.memory_space<vmem>>) attributes {dimension_semantics = [#tpu.dimension_semantics<parallel>], iteration_bounds = array<i64: 2>, scalar_prefetch = 0 : i64, scratch_operands = 0 : i64, tpu.core_type = #tpu.core_type<tc>, window_params = [{transform_indices = @transform_0, window_bounds = array<i64: 128, 8>}, {pipeline_mode = #tpu.pipeline_mode<synchronous>, transform_indices = @transform_1, window_bounds = array<i64: 256, 128>}, {pipeline_mode = #tpu.pipeline_mode<synchronous>, transform_indices = @transform_2, window_bounds = array<i64: 1, 128>}, {pipeline_mode = #tpu.pipeline_mode<synchronous>, transform_indices = @transform_3, window_bounds = array<i64: 128, 256>}, {pipeline_mode = #tpu.pipeline_mode<synchronous>, transform_indices = @transform_4, window_bounds = array<i64: 1, 256>}, {transform_indices = @transform_5, window_bounds = array<i64: 128, 256>}]} {
    %c0 = arith.constant 0 : index
    %c0_0 = arith.constant 0 : index
    %0 = vector.load %arg1[%c0, %c0_0] : memref<128x8xi32, #tpu.memory_space<vmem>>, vector<128x8xi32>
    %1 = tpu.iota {dimensions = array<i32: 1>} : vector<128x256xi32>
    %cst = arith.constant 0.000000e+00 : f32
    %2 = vector.broadcast %cst : f32 to vector<128x256xf32>
    %3 = vector.extract_strided_slice %0 {offsets = [0, 0], sizes = [128, 1], strides = [1, 1]} : vector<128x8xi32> to vector<128x1xi32>
    %4 = vector.broadcast %3 : vector<128x1xi32> to vector<128x256xi32>
    %5 = arith.cmpi eq, %1, %4 : vector<128x256xi32>
    %6 = arith.extui %5 : vector<128x256xi1> to vector<128x256xi32>
    %7 = arith.sitofp %6 : vector<128x256xi32> to vector<128x256xf32>
    %8 = arith.addf %2, %7 : vector<128x256xf32>
    %9 = vector.extract_strided_slice %0 {offsets = [0, 1], sizes = [128, 1], strides = [1, 1]} : vector<128x8xi32> to vector<128x1xi32>
    %10 = vector.broadcast %9 : vector<128x1xi32> to vector<128x256xi32>
    %11 = arith.cmpi eq, %1, %10 : vector<128x256xi32>
    %12 = arith.extui %11 : vector<128x256xi1> to vector<128x256xi32>
    %13 = arith.sitofp %12 : vector<128x256xi32> to vector<128x256xf32>
    %14 = arith.addf %8, %13 : vector<128x256xf32>
    %15 = vector.extract_strided_slice %0 {offsets = [0, 2], sizes = [128, 1], strides = [1, 1]} : vector<128x8xi32> to vector<128x1xi32>
    %16 = vector.broadcast %15 : vector<128x1xi32> to vector<128x256xi32>
    %17 = arith.cmpi eq, %1, %16 : vector<128x256xi32>
    %18 = arith.extui %17 : vector<128x256xi1> to vector<128x256xi32>
    %19 = arith.sitofp %18 : vector<128x256xi32> to vector<128x256xf32>
    %20 = arith.addf %14, %19 : vector<128x256xf32>
    %21 = vector.extract_strided_slice %0 {offsets = [0, 3], sizes = [128, 1], strides = [1, 1]} : vector<128x8xi32> to vector<128x1xi32>
    %22 = vector.broadcast %21 : vector<128x1xi32> to vector<128x256xi32>
    %23 = arith.cmpi eq, %1, %22 : vector<128x256xi32>
    %24 = arith.extui %23 : vector<128x256xi1> to vector<128x256xi32>
    %25 = arith.sitofp %24 : vector<128x256xi32> to vector<128x256xf32>
    %26 = arith.addf %20, %25 : vector<128x256xf32>
    %27 = vector.extract_strided_slice %0 {offsets = [0, 4], sizes = [128, 1], strides = [1, 1]} : vector<128x8xi32> to vector<128x1xi32>
    %28 = vector.broadcast %27 : vector<128x1xi32> to vector<128x256xi32>
    %29 = arith.cmpi eq, %1, %28 : vector<128x256xi32>
    %30 = arith.extui %29 : vector<128x256xi1> to vector<128x256xi32>
    %31 = arith.sitofp %30 : vector<128x256xi32> to vector<128x256xf32>
    %32 = arith.addf %26, %31 : vector<128x256xf32>
    %33 = vector.extract_strided_slice %0 {offsets = [0, 5], sizes = [128, 1], strides = [1, 1]} : vector<128x8xi32> to vector<128x1xi32>
    %34 = vector.broadcast %33 : vector<128x1xi32> to vector<128x256xi32>
    %35 = arith.cmpi eq, %1, %34 : vector<128x256xi32>
    %36 = arith.extui %35 : vector<128x256xi1> to vector<128x256xi32>
    %37 = arith.sitofp %36 : vector<128x256xi32> to vector<128x256xf32>
    %38 = arith.addf %32, %37 : vector<128x256xf32>
    %39 = vector.extract_strided_slice %0 {offsets = [0, 6], sizes = [128, 1], strides = [1, 1]} : vector<128x8xi32> to vector<128x1xi32>
    %40 = vector.broadcast %39 : vector<128x1xi32> to vector<128x256xi32>
    %41 = arith.cmpi eq, %1, %40 : vector<128x256xi32>
    %42 = arith.extui %41 : vector<128x256xi1> to vector<128x256xi32>
    %43 = arith.sitofp %42 : vector<128x256xi32> to vector<128x256xf32>
    %44 = arith.addf %38, %43 : vector<128x256xf32>
    %45 = vector.extract_strided_slice %0 {offsets = [0, 7], sizes = [128, 1], strides = [1, 1]} : vector<128x8xi32> to vector<128x1xi32>
    %46 = vector.broadcast %45 : vector<128x1xi32> to vector<128x256xi32>
    %47 = arith.cmpi eq, %1, %46 : vector<128x256xi32>
    %48 = arith.extui %47 : vector<128x256xi1> to vector<128x256xi32>
    %49 = arith.sitofp %48 : vector<128x256xi32> to vector<128x256xf32>
    %50 = arith.addf %44, %49 : vector<128x256xf32>
    %c0_1 = arith.constant 0 : index
    %c0_2 = arith.constant 0 : index
    %51 = vector.load %arg2[%c0_1, %c0_2] : memref<256x128xf32, #tpu.memory_space<vmem>>, vector<256x128xf32>
    %cst_3 = arith.constant dense<0.000000e+00> : vector<128x128xf32>
    %52 = tpu.matmul %50, %51, %cst_3 {dimension_numbers = #tpu.dot_dimension_numbers<[1], [0], [0], [1], [0, 0, 1, 1], [], []>} : vector<128x256xf32>, vector<256x128xf32>, vector<128x128xf32> -> vector<128x128xf32>
    %cst_4 = arith.constant 1.250000e-01 : f32
    %53 = vector.broadcast %cst_4 : f32 to vector<128x128xf32>
    %54 = arith.mulf %52, %53 : vector<128x128xf32>
    %c0_5 = arith.constant 0 : index
    %c0_6 = arith.constant 0 : index
    %55 = vector.load %arg3[%c0_5, %c0_6] : memref<1x128xf32, #tpu.memory_space<vmem>>, vector<1x128xf32>
    %56 = vector.broadcast %55 : vector<1x128xf32> to vector<128x128xf32>
    %57 = arith.addf %54, %56 : vector<128x128xf32>
    %c0_7 = arith.constant 0 : index
    %c0_8 = arith.constant 0 : index
    %58 = vector.load %arg4[%c0_7, %c0_8] : memref<128x256xf32, #tpu.memory_space<vmem>>, vector<128x256xf32>
    %cst_9 = arith.constant dense<0.000000e+00> : vector<128x256xf32>
    %59 = tpu.matmul %57, %58, %cst_9 {dimension_numbers = #tpu.dot_dimension_numbers<[1], [0], [0], [1], [0, 0, 1, 1], [], []>} : vector<128x128xf32>, vector<128x256xf32>, vector<128x256xf32> -> vector<128x256xf32>
    %c0_10 = arith.constant 0 : index
    %c0_11 = arith.constant 0 : index
    %60 = vector.load %arg5[%c0_10, %c0_11] : memref<1x256xf32, #tpu.memory_space<vmem>>, vector<1x256xf32>
    %61 = vector.broadcast %60 : vector<1x256xf32> to vector<128x256xf32>
    %62 = arith.addf %59, %61 : vector<128x256xf32>
    %c140_i32 = arith.constant 140 : i32
    %63 = vector.broadcast %c140_i32 : i32 to vector<128x256xi32>
    %64 = arith.cmpi slt, %1, %63 : vector<128x256xi32>
    %cst_12 = arith.constant -1.000000e+30 : f32
    %65 = vector.broadcast %cst_12 : f32 to vector<128x256xf32>
    %66 = arith.select %64, %62, %65 : vector<128x256xi1>, vector<128x256xf32>
    %cst_13 = arith.constant dense<0xFF800000> : vector<128xf32>
    %67 = vector.multi_reduction <maximumf>, %66, %cst_13 [1] : vector<128x256xf32> to vector<128xf32>
    %68 = vector.shape_cast %67 : vector<128xf32> to vector<128x1xf32>
    %69 = vector.broadcast %68 : vector<128x1xf32> to vector<128x256xf32>
    %70 = arith.subf %66, %69 : vector<128x256xf32>
    %71 = math.exp %70 : vector<128x256xf32>
    %cst_14 = arith.constant dense<0.000000e+00> : vector<128xf32>
    %72 = vector.multi_reduction <add>, %71, %cst_14 [1] : vector<128x256xf32> to vector<128xf32>
    %73 = vector.shape_cast %72 : vector<128xf32> to vector<128x1xf32>
    %74 = math.log %73 : vector<128x1xf32>
    %75 = arith.addf %68, %74 : vector<128x1xf32>
    %76 = vector.broadcast %75 : vector<128x1xf32> to vector<128x256xf32>
    %77 = arith.subf %66, %76 : vector<128x256xf32>
    %c0_15 = arith.constant 0 : index
    %c0_16 = arith.constant 0 : index
    %78 = vector.load %arg6[%c0_15, %c0_16] : memref<128x256xf32, #tpu.memory_space<vmem>>, vector<128x256xf32>
    tpu.vector_store %arg6[%c0_15, %c0_16], %77 {strides = array<i32>} : memref<128x256xf32, #tpu.memory_space<vmem>>, vector<128x256xf32>,
    return
  }
  func.func @transform_0(%arg0: i32) -> (i32, i32) {
    %c0_i32 = arith.constant 0 : i32
    %c0_i32_0 = arith.constant 0 : i32
    return %arg0, %c0_i32 : i32, i32
  }
  func.func @transform_1(%arg0: i32) -> (i32, i32) {
    %c0_i32 = arith.constant 0 : i32
    %c0_i32_0 = arith.constant 0 : i32
    %c0_i32_1 = arith.constant 0 : i32
    return %c0_i32, %c0_i32_0 : i32, i32
  }
  func.func @transform_2(%arg0: i32) -> (i32, i32) {
    %c0_i32 = arith.constant 0 : i32
    %c0_i32_0 = arith.constant 0 : i32
    %c0_i32_1 = arith.constant 0 : i32
    return %c0_i32, %c0_i32_0 : i32, i32
  }
  func.func @transform_3(%arg0: i32) -> (i32, i32) {
    %c0_i32 = arith.constant 0 : i32
    %c0_i32_0 = arith.constant 0 : i32
    %c0_i32_1 = arith.constant 0 : i32
    return %c0_i32, %c0_i32_0 : i32, i32
  }
  func.func @transform_4(%arg0: i32) -> (i32, i32) {
    %c0_i32 = arith.constant 0 : i32
    %c0_i32_0 = arith.constant 0 : i32
    %c0_i32_1 = arith.constant 0 : i32
    return %c0_i32, %c0_i32_0 : i32, i32
  }
  func.func @transform_5(%arg0: i32) -> (i32, i32) {
    %c0_i32 = arith.constant 0 : i32
    %c0_i32_0 = arith.constant 0 : i32
    return %arg0, %c0_i32 : i32, i32
  }
}

</mosaic_0001>

<bundles_post_ra>
// kernel: cbow_forward.1
= control target key start
LH: loop header
LB: loop body
LE: loop exit
PB: predicated region body
PF: predicated region fallthrough
CT: control target
= control target key end

     0   :  { %s3088_s18 = smov 0   ;;  %s5008_s0 = inlined_call_operand.vmem [shape: s32[256,8], index: 0, kind: input, shape index: {}]   ;;  %s5009_s1 = inlined_call_operand.vmem [shape: f32[256,128], index: 1, kind: input, shape index: {}]   ;;  %s5010_s2 = inlined_call_operand.vmem [shape: f32[1,128], index: 2, kind: input, shape index: {}]   ;;  %s5011_s3 = inlined_call_operand.vmem [shape: f32[128,256], index: 3, kind: input, shape index: {}]   ;;  %s5012_s4 = inlined_call_operand.vmem [shape: f32[1,256], index: 4, kind: input, shape index: {}]   ;;  %s5013_s5 = inlined_call_operand.vmem [shape: f32[256,256], index: 5, kind: output, shape index: {}]  }
   0x1 LB: > { %s2474_s19 = sadd.s32 4294967295, %s3047_s18   ;;  %p2478_p0 = scmp.ge.s32.totalorder %s3047_s18, 1  ;;  %s3047_s18 = sphi %s3088_s18, %s15_s18  }
   0x2   : > { %p188_p1 = scmp.lt.s32.totalorder %s3047_s18, 3 }
   0x4   : > { %p189_p2 = pnand %p2478_p0, %p188_p1 }
   0x6   : > { %192 = sbr.rel (%p189_p2) target bundleno = 1286 (0x506), region = 40 }
   0xb   : > { %s2479_s20 = sshll.u32 %s2474_s19, 4  ;;  %v5019_v0 = vmov 2   ;;  %v3050_v1 = vmov 0.0   ;;  %v5021_v5 = vmov 3   ;;  %v5017_v6 = vmov 0   ;;  %v1688_v23 = vld [vmem:[%s5009_s1 + $0xf8] sm:$0xff] }
   0xc   : > { %2854 = vset.pattern.permute.xlu0 %v5019_v0  ;;  %2841 = vset.pattern.permute.xlu1 %v5019_v0  ;;  %p218_p3 = scmp.lt.s32.totalorder %s2479_s20, 31  ;;  %v5025_v8 = vmov 1   ;;  %v5029_v11 = vmov 4   ;;  %v5015_v16 = vmov 5   ;;  %v5023_v17 = vmov 7   ;;  %v1672_v24 = vld [vmem:[%s5009_s1 + $0x78] sm:$0xff] }
   0xd   : > { %1981 = vmatprep.mubr.f32.mxu1 %v3050_v1  ;;  %v5027_v19 = vmov 6   ;;  %2744 = vmatprep.subr.mxu0 %v1688_v23  ;;  %v1687_v25 = vld [vmem:[%s5009_s1 + $0xf0] sm:$0xff]  ;;  %v1686_v27 = vld [vmem:[%s5009_s1 + $0xe8] sm:$0xff]  ;;  %v1685_v30 = vld [vmem:[%s5009_s1 + $0xe0] sm:$0xff] }
   0xe   : > { %s5068_s20 = smov (!%p218_p3, %s2479_s20), 31  ;;  %2745 = vmatpush3.msra.mxu0 %v1672_v24  ;;  %v1671_v26 = vld [vmem:[%s5009_s1 + $0x70] sm:$0xff]  ;;  %v1670_v29 = vld [vmem:[%s5009_s1 + $0x68] sm:$0xff]  ;;  %v1669_v31 = vld [vmem:[%s5009_s1 + $0x60] sm:$0xff] }
   0xf   : > { %s2480_s21 = sshll.u32 %s5068_s20, 3  ;;  %2746 = vmatprep.subr.mxu0 %v1687_v25  ;;  %v1684_v32 = vld [vmem:[%s5009_s1 + $0xd8] sm:$0xff]  ;;  %v1683_v34 = vld [vmem:[%s5009_s1 + $0xd0] sm:$0xff]  ;;  %v1682_v36 = vld [vmem:[%s5009_s1 + $0xc8] sm:$0xff]  ;;  %s2743_s23 = sshll.u32 %s5068_s20, 4 }
  0x10   : > { %s3105_s24 = scalar_lea.vmem %s5008_s0, %s2480_s21  ;;  %2747 = vmatpush3.msra.mxu0 %v1671_v26  ;;  %v1668_v33 = vld [vmem:[%s5009_s1 + $0x58] sm:$0xff]  ;;  %v1667_v35 = vld [vmem:[%s5009_s1 + $0x50] sm:$0xff]  ;;  %v1666_v37 = vld [vmem:[%s5009_s1 + $0x48] sm:$0xff]  ;;  %s4924_s27 = scalar_lea.vmem %s5013_s5, %s2743_s23 }
  0x11   : > { %v3108_v2 = vld [vmem:[%s3105_s24 + $0x18] sm:$0xff]  ;;  %v3111_v3 = vld [vmem:[%s3105_s24] sm:$0xff]  ;;  %v3116_v4 = vld [vmem:[%s3105_s24 + $0x8] sm:$0xff]  ;;  %2748 = vmatprep.subr.mxu0 %v1686_v27 }
  0x12   : > { %611 = vperm.xlu0 %2854, %v3108_v2   ;;  %602 = vperm.xlu1 %2841, %v3111_v3   ;;  %v3123_v7 = vld [vmem:[%s3105_s24 + $0x10] sm:$0xff]  ;;  %v3129_v9 = vld [vmem:[%s3105_s24 + $0x28] sm:$0xff]  ;;  %v3134_v10 = vld [vmem:[%s3105_s24 + $0x40] sm:$0xff] }
  0x13   : > { %v3146_v12 = vld [vmem:[%s3105_s24 + $0x20] sm:$0xff]  ;;  %v3152_v13 = vld [vmem:[%s3105_s24 + $0x38] sm:$0xff]  ;;  %v3158_v14 = vld [vmem:[%s3105_s24 + $0x50] sm:$0xff]  ;;  %2749 = vmatpush3.msra.mxu0 %v1670_v29 }
  0x14   : > { %v243_v15 = vld [vmem:[%s3105_s24 + $0x68] sm:$0xff]  ;;  %v3178_v18 = vld [vmem:[%s3105_s24 + $0x58] sm:$0xff]  ;;  %v3187_v20 = vld [vmem:[%s3105_s24 + $0x30] sm:$0xff]  ;;  %2750 = vmatprep.subr.mxu0 %v1685_v30 }
  0x15   : > { %v3192_v21 = vld [vmem:[%s3105_s24 + $0x48] sm:$0xff]  ;;  %v3198_v22 = vld [vmem:[%s3105_s24 + $0x60] sm:$0xff]  ;;  %v3230_v28 = vld [vmem:[%s3105_s24 + $0x70] sm:$0xff]  ;;  %2751 = vmatpush3.msra.mxu0 %v1669_v31 }
  0x16   : > { %2855 = vset.pattern.permute.xlu0 %v5021_v5  ;;  %2842 = vset.pattern.permute.xlu1 %v5017_v6  ;;  %v1681_v38 = vld [vmem:[%s5009_s1 + $0xc0] sm:$0xff]  ;;  %v1680_v40 = vld [vmem:[%s5009_s1 + $0xb8] sm:$0xff]  ;;  %v1679_v42 = vld [vmem:[%s5009_s1 + $0xb0] sm:$0xff] }
  0x17   : > { %778 = vperm.xlu0 %2855, %v3111_v3   ;;  %253 = vperm.xlu1 %2842, %v3116_v4   ;;  %v1665_v39 = vld [vmem:[%s5009_s1 + $0x40] sm:$0xff]  ;;  %v1664_v41 = vld [vmem:[%s5009_s1 + $0x38] sm:$0xff]  ;;  %v1663_v43 = vld [vmem:[%s5009_s1 + $0x30] sm:$0xff] }
  0x18   : > { %2752 = vmatprep.subr.mxu0 %v1684_v32  ;;  %v1678_v44 = vld [vmem:[%s5009_s1 + $0xa8] sm:$0xff]  ;;  %v1677_v46 = vld [vmem:[%s5009_s1 + $0xa0] sm:$0xff]  ;;  %v1676_v48 = vld [vmem:[%s5009_s1 + $0x98] sm:$0xff] }
  0x19   : > { %2753 = vmatpush3.msra.mxu0 %v1668_v33  ;;  %v1662_v45 = vld [vmem:[%s5009_s1 + $0x28] sm:$0xff]  ;;  %v1661_v47 = vld [vmem:[%s5009_s1 + $0x20] sm:$0xff]  ;;  %v1660_v49 = vld [vmem:[%s5009_s1 + $0x18] sm:$0xff] }
  0x1a   : > { %2754 = vmatprep.subr.mxu0 %v1683_v34  ;;  %v1675_v50 = vld [vmem:[%s5009_s1 + $0x90] sm:$0xff]  ;;  %v1674_v54 = vld [vmem:[%s5009_s1 + $0x88] sm:$0xff]  ;;  %v1673_v56 = vld [vmem:[%s5009_s1 + $0x80] sm:$0xff] }
  0x1b   : > { %784 = vperm.xlu0 %2855, %v3123_v7   ;;  %2843 = vset.pattern.permute.xlu1 %v5025_v8  ;;  %v1659_v51 = vld [vmem:[%s5009_s1 + $0x10] sm:$0xff]  ;;  %v1658_v55 = vld [vmem:[%s5009_s1 + $0x8] sm:$0xff]  ;;  %v1657_v57 = vld [vmem:[%s5009_s1] sm:$0xff] }
  0x1c   : > { %429 = vperm.xlu1 %2843, %v3116_v4   ;;  %2755 = vmatpush3.msra.mxu0 %v1667_v35  ;;  %v245_v25 = vld [vmem:[%s3105_s24 + $0x78] sm:$0xff] }
  0x1d   : > { %2756 = vmatprep.subr.mxu0 %v1682_v36 }
  0x1e   : > { %2757 = vmatpush3.msra.mxu0 %v1666_v37 }
  0x1f   : > { %793 = vperm.xlu0 %2855, %v3129_v9   ;;  %2758 = vmatprep.subr.mxu0 %v1681_v38 }
  0x20   : > { %2844 = vset.pattern.permute.xlu1 %v5019_v0  ;;  %2759 = vmatpush3.msra.mxu0 %v1665_v39 }
  0x21   : > { %605 = vperm.xlu1 %2844, %v3116_v4   ;;  %2760 = vmatprep.subr.mxu0 %v1680_v40 }
  0x22   : > { %2761 = vmatpush3.msra.mxu0 %v1664_v41 }
  0x23   : > { %802 = vperm.xlu0 %2855, %v3134_v10   ;;  %2762 = vmatprep.subr.mxu0 %v1679_v42 }
  0x24   : > { %2763 = vmatpush3.msra.mxu0 %v1663_v43 }
  0x25   : > { %2845 = vset.pattern.permute.xlu1 %v5029_v11  ;;  %2764 = vmatprep.subr.mxu0 %v1678_v44  ;;  %v5014_v44 = vlaneseq }
  0x26   : > { %954 = vperm.xlu1 %2845, %v3111_v3   ;;  %2765 = vmatpush3.msra.mxu0 %v1662_v45 }
  0x27   : > { %2886 = vset.pattern.permute.xlu0 %v5017_v6  ;;  %2766 = vmatprep.subr.mxu0 %v1677_v46 }
  0x28   : > { %250 = vperm.xlu0 %2886, %v3111_v3   ;;  %2767 = vmatpush3.msra.mxu0 %v1661_v47  ;;  %v3455_v47 = vand.u32 127, %v5014_v44 }
  0x29   : > { %2768 = vmatprep.subr.mxu0 %v1676_v48 }
  0x2a   : > { %2846 = vset.pattern.permute.xlu1 %v5025_v8  ;;  %2769 = vmatpush3.msra.mxu0 %v1660_v49 }
  0x2b   : > { %432 = vperm.xlu1 %2846, %v3123_v7   ;;  %2770 = vmatprep.subr.mxu0 %v1675_v50  ;;  %v3463_v50 = vadd.s32 128, %v3455_v47 }
  0x2c   : > { %256 = vperm.xlu0 %2886, %v3123_v7   ;;  %2771 = vmatpush3.msra.mxu0 %v1659_v51 }
  0x2d   : > { %2772 = vmatprep.subr.mxu0 %v1674_v54 }
  0x2e   : > { %2773 = vmatpush3.msra.mxu0 %v1658_v55 }
  0x2f   : > { %2847 = vset.pattern.permute.xlu1 %v5021_v5  ;;  %2774 = vmatprep.subr.mxu0 %v1673_v56 }
  0x30   : > { %262 = vperm.xlu0 %2886, %v3146_v12   ;;  %781 = vperm.xlu1 %2847, %v3116_v4  }
  0x31   : > { %2775 = vmatpush3.msra.mxu0 %v1657_v57 }
  0x34   : > { %271 = vperm.xlu0 %2886, %v3152_v13   ;;  %2848 = vset.pattern.permute.xlu1 %v5019_v0 }
  0x35   : > { %608 = vperm.xlu1 %2848, %v3123_v7  }
  0x38   : > { %280 = vperm.xlu0 %2886, %v3158_v14  }
  0x39   : > { %2849 = vset.pattern.permute.xlu1 %v5029_v11 }
  0x3a   : > { %957 = vperm.xlu1 %2849, %v3116_v4  }
  0x3c   : > { %289 = vperm.xlu0 %2886, %v243_v15  }
  0x3e   : > { %2850 = vset.pattern.permute.xlu1 %v5017_v6 }
  0x3f   : > { %259 = vperm.xlu1 %2850, %v3108_v2  }
  0x40   : > { %2907 = vset.pattern.permute.xlu0 %v5015_v16 }
  0x41   : > { %1130 = vperm.xlu0 %2907, %v3111_v3  }
  0x43   : > { %2851 = vset.pattern.permute.xlu1 %v5025_v8 }
  0x44   : > { %435 = vperm.xlu1 %2851, %v3108_v2  }
  0x45   : > { %1136 = vperm.xlu0 %2907, %v3123_v7  }
  0x48   : > { %2852 = vset.pattern.permute.xlu1 %v5015_v16 }
  0x49   : > { %1145 = vperm.xlu0 %2907, %v3129_v9   ;;  %1133 = vperm.xlu1 %2852, %v3116_v4  }
  0x4d   : > { %1154 = vperm.xlu0 %2907, %v3134_v10   ;;  %2853 = vset.pattern.permute.xlu1 %v5023_v17 }
  0x4e   : > { %1482 = vperm.xlu1 %2853, %v3111_v3  }
  0x51   : > { %1163 = vperm.xlu0 %2907, %v3178_v18  }
  0x52   : > { %2856 = vset.pattern.permute.xlu1 %v5029_v11 }
  0x53   : > { %960 = vperm.xlu1 %2856, %v3123_v7  }
  0x55   : > { %2910 = vset.pattern.permute.xlu0 %v5029_v11 }
  0x56   : > { %963 = vperm.xlu0 %2910, %v3108_v2  }
  0x57   : > { %2857 = vset.pattern.permute.xlu1 %v5027_v19 }
  0x58   : > { %1309 = vperm.xlu1 %2857, %v3116_v4  }
  0x5a   : > { %972 = vperm.xlu0 %2910, %v3187_v20  }
  0x5c   : > { %2858 = vset.pattern.permute.xlu1 %v5025_v8 }
  0x5d   : > { %438 = vperm.xlu1 %2858, %v3146_v12  }
  0x5e   : > { %981 = vperm.xlu0 %2910, %v3192_v21  }
  0x61   : > { %2859 = vset.pattern.permute.xlu1 %v5021_v5 }
  0x62   : > { %990 = vperm.xlu0 %2910, %v3198_v22   ;;  %787 = vperm.xlu1 %2859, %v3108_v2  }
  0x66   : > { %2913 = vset.pattern.permute.xlu0 %v5025_v8  ;;  %2860 = vset.pattern.permute.xlu1 %v5023_v17 }
  0x67   : > { %426 = vperm.xlu0 %2913, %v3111_v3   ;;  %1485 = vperm.xlu1 %2860, %v3116_v4  }
  0x6b   : > { %441 = vperm.xlu0 %2913, %v3129_v9   ;;  %2861 = vset.pattern.permute.xlu1 %v5019_v0 }
  0x6c   : > { %614 = vperm.xlu1 %2861, %v3146_v12  }
  0x6f   : > { %450 = vperm.xlu0 %2913, %v3134_v10  }
  0x70   : > { %2862 = vset.pattern.permute.xlu1 %v5027_v19 }
  0x71   : > { %1312 = vperm.xlu1 %2862, %v3123_v7  }
  0x73   : > { %459 = vperm.xlu0 %2913, %v3178_v18  }
  0x75   : > { %2863 = vset.pattern.permute.xlu1 %v5017_v6 }
  0x76   : > { %265 = vperm.xlu1 %2863, %v3129_v9  }
  0x77   : > { %468 = vperm.xlu0 %2913, %v3230_v28  }
  0x7a   : > { %2864 = vset.pattern.permute.xlu1 %v5021_v5 }
  0x7b   : > { %2916 = vset.pattern.permute.xlu0 %v5023_v17  ;;  %790 = vperm.xlu1 %2864, %v3146_v12  }
  0x7c   : > { %1488 = vperm.xlu0 %2916, %v3123_v7  }
  0x7f   : > { %2865 = vset.pattern.permute.xlu1 %v5015_v16 }
  0x80   : > { %1497 = vperm.xlu0 %2916, %v3129_v9   ;;  %1139 = vperm.xlu1 %2865, %v3108_v2  }
  0x84   : > { %1506 = vperm.xlu0 %2916, %v3134_v10   ;;  %2866 = vset.pattern.permute.xlu1 %v5019_v0 }
  0x85   : > { %617 = vperm.xlu1 %2866, %v3129_v9  }
  0x88   : > { %1515 = vperm.xlu0 %2916, %v3178_v18  }
  0x89   : > { %2867 = vset.pattern.permute.xlu1 %v5029_v11 }
  0x8a   : > { %966 = vperm.xlu1 %2867, %v3146_v12  }
  0x8c   : > { %2919 = vset.pattern.permute.xlu0 %v5027_v19 }
  0x8d   : > { %1306 = vperm.xlu0 %2919, %v3111_v3   ;;  %v3319_v52 = vpop.permute.xlu1 %602  ;;  %v3321_v53 = vpop.permute.xlu0 %611 }
  0x8e   : > { %2868 = vset.pattern.permute.xlu1 %v5017_v6  ;;  %vm649_vm0 = vcmp.eq.s32.totalorder %v3455_v47, %v3319_v52  ;;  %vm650_vm1 = vcmp.eq.s32.totalorder %v3463_v50, %v3319_v52  ;;  %vm655_vm3 = vcmp.eq.s32.totalorder %v3455_v47, %v3321_v53  ;;  %vm656_vm4 = vcmp.eq.s32.totalorder %v3463_v50, %v3321_v53 }
  0x8f   : > { %268 = vperm.xlu1 %2868, %v3187_v20   ;;  %v3479_v55 = vsel %vm649_vm0, 1.0, %v3050_v1  ;;  %v3490_v56 = vsel %vm650_vm1, 1.0, %v3050_v1 }
  0x91   : > { %1315 = vperm.xlu0 %2919, %v3108_v2  }
  0x92   : > { %v3338_v58 = vpop.permute.xlu1 %253  ;;  %v3340_v59 = vpop.permute.xlu0 %778 }
  0x93   : > { %2869 = vset.pattern.permute.xlu1 %v5025_v8  ;;  %vm299_vm6 = vcmp.eq.s32.totalorder %v3455_v47, %v3338_v58  ;;  %vm300_vm7 = vcmp.eq.s32.totalorder %v3463_v50, %v3338_v58  ;;  %vm825_vm9 = vcmp.eq.s32.totalorder %v3455_v47, %v3340_v59  ;;  %vm826_vm10 = vcmp.eq.s32.totalorder %v3463_v50, %v3340_v59 }
  0x94   : > { %444 = vperm.xlu1 %2869, %v3187_v20   ;;  %v3511_v58 = vsel %vm656_vm4, 1.0, %v3050_v1  ;;  %v2486_v44 = vsel %vm299_vm6, 1.0, %v3050_v1 }
  0x95   : > { %1324 = vperm.xlu0 %2919, %v3187_v20  }
  0x96   : > { %v3345_v60 = vpop.permute.xlu0 %784 }
  0x97   : > { %v3347_v61 = vpop.permute.xlu1 %429  ;;  %vm829_vm12 = vcmp.eq.s32.totalorder %v3455_v47, %v3345_v60  ;;  %vm830_vm13 = vcmp.eq.s32.totalorder %v3463_v50, %v3345_v60 }
  0x98   : > { %2870 = vset.pattern.permute.xlu1 %v5015_v16  ;;  %vm475_vm2 = vcmp.eq.s32.totalorder %v3455_v47, %v3347_v61  ;;  %vm476_vm5 = vcmp.eq.s32.totalorder %v3463_v50, %v3347_v61  ;;  %v3508_v61 = vsel %vm655_vm3, 1.0, %v3050_v1  ;;  %v2584_v60 = vsel %vm829_vm12, 1.0, %v3050_v1 }
  0x99   : > { %1333 = vperm.xlu0 %2919, %v3192_v21   ;;  %1142 = vperm.xlu1 %2870, %v3146_v12   ;;  %v2518_v53 = vsel %vm475_vm2, 1.0, %v3050_v1 }
  0x9a   : > { %v3352_v62 = vpop.permute.xlu0 %793 }
  0x9c   : > { %v3354_v63 = vpop.permute.xlu1 %605 }
  0x9d   : > { %1342 = vperm.xlu0 %2919, %v3198_v22   ;;  %2871 = vset.pattern.permute.xlu1 %v5023_v17  ;;  %vm651_vm8 = vcmp.eq.s32.totalorder %v3455_v47, %v3354_v63  ;;  %vm652_vm11 = vcmp.eq.s32.totalorder %v3463_v50, %v3354_v63 }
  0x9e   : > { %1491 = vperm.xlu1 %2871, %v3108_v2   ;;  %v3359_v3 = vpop.permute.xlu0 %802 }
  0xa1   : > { %2922 = vset.pattern.permute.xlu0 %v5019_v0  ;;  %v3362_v4 = vpop.permute.xlu1 %954 }
  0xa2   : > { %620 = vperm.xlu0 %2922, %v3187_v20   ;;  %2872 = vset.pattern.permute.xlu1 %v5029_v11 }
  0xa3   : > { %v3366_v7 = vpop.permute.xlu0 %250  ;;  %969 = vperm.xlu1 %2872, %v3129_v9  }
  0xa4   : > { %vm297_vm2 = vcmp.eq.s32.totalorder %v3455_v47, %v3366_v7  ;;  %vm298_vm3 = vcmp.eq.s32.totalorder %v3463_v50, %v3366_v7 }
  0xa6   : > { %v3369_v15 = vpop.permute.xlu1 %432  ;;  %629 = vperm.xlu0 %2922, %v3192_v21  }
  0xa7   : > { %v3372_v2 = vpop.permute.xlu0 %256  ;;  %2873 = vset.pattern.permute.xlu1 %v5027_v19  ;;  %vm477_vm14 = vcmp.eq.s32.totalorder %v3455_v47, %v3369_v15  ;;  %vm478_vm0 = vcmp.eq.s32.totalorder %v3463_v50, %v3369_v15 }
  0xa8   : > { %1318 = vperm.xlu1 %2873, %v3146_v12   ;;  %vm301_vm15 = vcmp.eq.s32.totalorder %v3455_v47, %v3372_v2  ;;  %vm302_vm1 = vcmp.eq.s32.totalorder %v3463_v50, %v3372_v2  ;;  %v2484_v2 = vsel %vm297_vm2, 1.0, %v3050_v1 }
  0xa9   : > { %v2488_v15 = vsel %vm301_vm15, 1.0, %v3050_v1  ;;  %v2489_v7 = vsel %vm302_vm1, 1.0, %v3050_v1 }
  0xaa   : > { %638 = vperm.xlu0 %2922, %v3198_v22  }
  0xab   : > { %v3377_v23 = vpop.permute.xlu1 %781  ;;  %v3379_v24 = vpop.permute.xlu0 %262 }
  0xac   : > { %2874 = vset.pattern.permute.xlu1 %v5025_v8 }
  0xad   : > { %447 = vperm.xlu1 %2874, %v3152_v13  }
  0xae   : > { %647 = vperm.xlu0 %2922, %v245_v25  }
  0xaf   : > { %v3384_v26 = vpop.permute.xlu0 %271 }
  0xb0   : > { %5040 = vst [vmem:[#allocation2_spill] sm:$0xff] %v3384_v26  ;;  %v3386_v27 = vpop.permute.xlu1 %608 }
  0xb1   : > { %2875 = vset.pattern.permute.xlu1 %v5021_v5  ;;  %vm653_vm4 = vcmp.eq.s32.totalorder %v3455_v47, %v3386_v27 }
  0xb2   : > { %796 = vperm.xlu1 %2875, %v3187_v20   ;;  %2927 = vset.pattern.permute.xlu0 %v5021_v5 }
  0xb3   : > { %v3391_v29 = vpop.permute.xlu0 %280  ;;  %811 = vperm.xlu0 %2927, %v3178_v18  }
  0xb4   : > { %5041 = vst [vmem:[#allocation3_spill] sm:$0xff] %v3391_v29 }
  0xb5   : > { %v3394_v30 = vpop.permute.xlu1 %957 }
  0xb6   : > { %2876 = vset.pattern.permute.xlu1 %v5023_v17  ;;  %vm1003_vm12 = vcmp.eq.s32.totalorder %v3455_v47, %v3394_v30 }
  0xb7   : > { %1494 = vperm.xlu1 %2876, %v3146_v12   ;;  %v3398_v31 = vpop.permute.xlu0 %289  ;;  %820 = vperm.xlu0 %2927, %v3230_v28  }
  0xb8   : > { %5042 = vst [vmem:[#allocation4_spill] sm:$0xff] %v3398_v31 }
  0xba   : > { %v3401_v32 = vpop.permute.xlu1 %259 }
  0xbb   : > { %2877 = vset.pattern.permute.xlu1 %v5019_v0  ;;  %823 = vperm.xlu0 %2927, %v245_v25   ;;  %vm303_vm15 = vcmp.eq.s32.totalorder %v3455_v47, %v3401_v32  ;;  %vm304_vm1 = vcmp.eq.s32.totalorder %v3463_v50, %v3401_v32 }
  0xbc   : > { %623 = vperm.xlu1 %2877, %v3152_v13   ;;  %v3405_v33 = vpop.permute.xlu0 %1130 }
  0xbd   : > { %vm1177_vm2 = vcmp.eq.s32.totalorder %v3455_v47, %v3405_v33 }
  0xbf   : > { %v3407_v34 = vpop.permute.xlu1 %435  ;;  %2932 = vset.pattern.permute.xlu0 %v5029_v11 }
  0xc0   : > { %2878 = vset.pattern.permute.xlu1 %v5027_v19  ;;  %v3411_v12 = vpop.permute.xlu0 %1136  ;;  %999 = vperm.xlu0 %2932, %v245_v25   ;;  %v2519_v25 = vsel %vm476_vm5, 1.0, %v3050_v1 }
  0xc1   : > { %1321 = vperm.xlu1 %2878, %v3129_v9  }
  0xc4   : > { %v3414_v35 = vpop.permute.xlu1 %1133  ;;  %v3416_v36 = vpop.permute.xlu0 %1145  ;;  %2935 = vset.pattern.permute.xlu0 %v5023_v17 }
  0xc5   : > { %2879 = vset.pattern.permute.xlu1 %v5017_v6  ;;  %1524 = vperm.xlu0 %2935, %v3230_v28  }
  0xc6   : > { %274 = vperm.xlu1 %2879, %v3134_v10  }
  0xc8   : > { %v3422_v37 = vpop.permute.xlu0 %1154 }
  0xc9   : > { %5043 = vst [vmem:[#allocation5_spill] sm:$0xff] %v3422_v37  ;;  %v3424_v38 = vpop.permute.xlu1 %1482 }
  0xca   : > { %2880 = vset.pattern.permute.xlu1 %v5021_v5  ;;  %v3529_v5 = vsel %vm825_vm9, 1.0, %v3050_v1  ;;  %vm1001_vm9 = vcmp.eq.s32.totalorder %v3455_v47, %v3362_v4 }
  0xcb   : > { %799 = vperm.xlu1 %2880, %v3152_v13  }
  0xcc   : > { %v3428_v9 = vpop.permute.xlu0 %1163 }
  0xcd   : > { %5044 = vst [vmem:[#allocation6_spill] sm:$0xff] %v3428_v9 }
  0xce   : > { %v3430_v39 = vpop.permute.xlu1 %960 }
  0xcf   : > { %2881 = vset.pattern.permute.xlu1 %v5015_v16 }
  0xd0   : > { %1148 = vperm.xlu1 %2881, %v3187_v20  }
  0xd1   : > { %v3434_v40 = vpop.permute.xlu0 %963 }
  0xd3   : > { %v3436_v41 = vpop.permute.xlu1 %1309 }
  0xd4   : > { %2882 = vset.pattern.permute.xlu1 %v5019_v0 }
  0xd5   : > { %626 = vperm.xlu1 %2882, %v3134_v10   ;;  %v3440_v28 = vpop.permute.xlu0 %972 }
  0xd8   : > { %v3442_v42 = vpop.permute.xlu1 %438 }
  0xd9   : > { %2883 = vset.pattern.permute.xlu1 %v5029_v11  ;;  %v3445_v43 = vpop.permute.xlu0 %981  ;;  %v3547_v11 = vsel %vm830_vm13, 1.0, %v3050_v1  ;;  %vm1004_vm13 = vcmp.eq.s32.totalorder %v3463_v50, %v3394_v30 }
  0xda   : > { %5045 = vst [vmem:[#allocation7_spill] sm:$0xff] %v3445_v43  ;;  %975 = vperm.xlu1 %2883, %v3152_v13   ;;  %v2614_v43 = vsel %vm1003_vm12, 1.0, %v3050_v1  ;;  %vm1007_vm12 = vcmp.eq.s32.totalorder %v3455_v47, %v3434_v40 }
  0xdd   : > { %v3448_v45 = vpop.permute.xlu1 %787  ;;  %v3450_v46 = vpop.permute.xlu0 %990 }
  0xde   : > { %5046 = vst [vmem:[#allocation8_spill] sm:$0xff] %v3450_v46  ;;  %2884 = vset.pattern.permute.xlu1 %v5017_v6  ;;  %v2550_v6 = vsel %vm651_vm8, 1.0, %v3050_v1  ;;  %vm654_vm8 = vcmp.eq.s32.totalorder %v3463_v50, %v3386_v27 }
  0xdf   : > { %277 = vperm.xlu1 %2884, %v3192_v21   ;;  %v2553_v29 = vsel %vm654_vm8, 1.0, %v3050_v1  ;;  %vm1005_vm8 = vcmp.eq.s32.totalorder %v3455_v47, %v3430_v39 }
  0xe2   : > { %v3457_v48 = vpop.permute.xlu0 %426  ;;  %v3459_v49 = vpop.permute.xlu1 %1485 }
  0xe3   : > { %2885 = vset.pattern.permute.xlu1 %v5025_v8  ;;  %v571_v8 = vadd.f32 %v2518_v53, %v2486_v44  ;;  %vm473_vm5 = vcmp.eq.s32.totalorder %v3455_v47, %v3457_v48  ;;  %vm474_vm6 = vcmp.eq.s32.totalorder %v3463_v50, %v3457_v48  ;;  %v2485_v53 = vsel %vm298_vm3, 1.0, %v3050_v1 }
  0xe4   : > { %453 = vperm.xlu1 %2885, %v3192_v21   ;;  %v2552_v48 = vsel %vm653_vm4, 1.0, %v3050_v1  ;;  %vm1178_vm3 = vcmp.eq.s32.totalorder %v3463_v50, %v3405_v33  ;;  %vm1181_vm4 = vcmp.eq.s32.totalorder %v3455_v47, %v3411_v12 }
  0xe5   : > { %v747_v59 = vadd.f32 %v2550_v6, %v571_v8  ;;  %v2520_v8 = vsel %vm477_vm14, 1.0, %v3050_v1  ;;  %vm479_vm14 = vcmp.eq.s32.totalorder %v3455_v47, %v3407_v34 }
  0xe6   : > { %v3466_v51 = vpop.permute.xlu0 %441 }
  0xe7   : > { %v3470_v54 = vpop.permute.xlu1 %614 }
  0xe8   : > { %2887 = vset.pattern.permute.xlu1 %v5015_v16  ;;  %v2487_v16 = vsel %vm300_vm7, 1.0, %v3050_v1  ;;  %vm827_vm7 = vcmp.eq.s32.totalorder %v3455_v47, %v3377_v23 }
  0xe9   : > { %1151 = vperm.xlu1 %2887, %v3152_v13   ;;  %v572_v19 = vadd.f32 %v2519_v25, %v2487_v16  ;;  %v5048_v16 = vmov 4   ;;  %v573_v25 = vadd.f32 %v2520_v8, %v2488_v15  ;;  %v2582_v46 = vsel %vm827_vm7, 1.0, %v3050_v1 }
  0xea   : > { %v3487_v52 = vpop.permute.xlu0 %450  ;;  %v5050_v8 = vmov 6   ;;  %vm1180_vm7 = vcmp.eq.s32.totalorder %v3463_v50, %v3414_v35 }
  0xeb   : > { %v749_v15 = vadd.f32 %v2552_v48, %v573_v25  ;;  %v2612_v48 = vsel %vm1001_vm9, 1.0, %v3050_v1  ;;  %vm1006_vm9 = vcmp.eq.s32.totalorder %v3463_v50, %v3430_v39  ;;  %v2647_v39 = vsel %vm1180_vm7, 1.0, %v3050_v1 }
  0xec   : > { %v3505_v57 = vpop.permute.xlu1 %1312 }
  0xed   : > { %2888 = vset.pattern.permute.xlu1 %v5023_v17  ;;  %v3535_v17 = vsel %vm826_vm10, 1.0, %v3050_v1  ;;  %vm828_vm10 = vcmp.eq.s32.totalorder %v3463_v50, %v3377_v23  ;;  %vm1357_vm7 = vcmp.eq.s32.totalorder %v3455_v47, %v3505_v57 }
  0xee   : > { %1500 = vperm.xlu1 %2888, %v3187_v20   ;;  %v3523_v0 = vpop.permute.xlu0 %459  ;;  %v2551_v20 = vsel %vm652_vm11, 1.0, %v3050_v1  ;;  %vm1002_vm11 = vcmp.eq.s32.totalorder %v3463_v50, %v3362_v4  ;;  %v2583_v23 = vsel %vm828_vm10, 1.0, %v3050_v1  ;;  %v2490_v4 = vsel %vm303_vm15, 1.0, %v3050_v1 }
  0xef   : > { %5047 = vst [vmem:[#allocation9_spill] sm:$0xff] %v3523_v0  ;;  %v748_v44 = vadd.f32 %v2551_v20, %v572_v19  ;;  %v2521_v19 = vsel %vm478_vm0, 1.0, %v3050_v1  ;;  %v2516_v20 = vsel %vm473_vm5, 1.0, %v3050_v1  ;;  %v2613_v30 = vsel %vm1002_vm11, 1.0, %v3050_v1 }
  0xf0   : > { %v574_v27 = vadd.f32 %v2521_v19, %v2489_v7  ;;  %v569_v19 = vadd.f32 %v2516_v20, %v2484_v2  ;;  %vm480_vm0 = vcmp.eq.s32.totalorder %v3463_v50, %v3407_v34  ;;  %v923_v0 = vadd.f32 %v2582_v46, %v747_v59 }
  0xf1   : > { %v3553_v63 = vpop.permute.xlu1 %265  ;;  %v2615_v2 = vsel %vm1004_vm13, 1.0, %v3050_v1  ;;  %v924_v26 = vadd.f32 %v2583_v23, %v748_v44  ;;  %v2523_v34 = vsel %vm480_vm0, 1.0, %v3050_v1  ;;  %vm1182_vm5 = vcmp.eq.s32.totalorder %v3463_v50, %v3411_v12 }
  0xf2   : > { %2889 = vset.pattern.permute.xlu1 %v5048_v16  ;;  %v3562_v6 = vpop.permute.xlu0 %468  ;;  %v750_v25 = vadd.f32 %v2553_v29, %v574_v27  ;;  %v925_v29 = vadd.f32 %v2584_v60, %v749_v15  ;;  %v5051_v27 = vmov 1   ;;  %v745_v46 = vadd.f32 %v3479_v55, %v569_v19 }
  0xf3   : > { %5049 = vst [vmem:[#allocation10_spill] sm:$0xff] %v3562_v6  ;;  %978 = vperm.xlu1 %2889, %v3134_v10   ;;  %v2517_v6 = vsel %vm474_vm6, 1.0, %v3050_v1  ;;  %v1099_v44 = vadd.f32 %v2614_v43, %v923_v0  ;;  %v1100_v23 = vadd.f32 %v2615_v2, %v924_v26  ;;  %v2491_v60 = vsel %vm304_vm1, 1.0, %v3050_v1 }
  0xf4   : > { %v570_v7 = vadd.f32 %v2517_v6, %v2485_v53  ;;  %v2522_v6 = vsel %vm479_vm14, 1.0, %v3050_v1  ;;  %v926_v32 = vadd.f32 %v3547_v11, %v750_v25  ;;  %v576_v0 = vadd.f32 %v2523_v34, %v2491_v60 }
  0xf5   : > { %v575_v37 = vadd.f32 %v2522_v6, %v2490_v4  ;;  %vm1179_vm6 = vcmp.eq.s32.totalorder %v3455_v47, %v3414_v35  ;;  %v921_v26 = vadd.f32 %v3529_v5, %v745_v46  ;;  %v5052_v12 = vmov 3  }
  0xf6   : > { %v3586_v31 = vpop.permute.xlu1 %790  ;;  %v746_v59 = vadd.f32 %v3490_v56, %v570_v7  ;;  %v2644_v56 = vsel %vm1177_vm2, 1.0, %v3050_v1  ;;  %v2645_v43 = vsel %vm1178_vm3, 1.0, %v3050_v1  ;;  %v2648_v15 = vsel %vm1181_vm4, 1.0, %v3050_v1 }
  0xf7   : > { %v3592_v9 = vpop.permute.xlu0 %1488  ;;  %2890 = vset.pattern.permute.xlu1 %v5050_v8  ;;  %v2649_v35 = vsel %vm1182_vm5, 1.0, %v3050_v1  ;;  %v751_v19 = vadd.f32 %v3508_v61, %v575_v37  ;;  %v2646_v7 = vsel %vm1179_vm6, 1.0, %v3050_v1  ;;  %vm1529_vm10 = vcmp.eq.s32.totalorder %v3455_v47, %v3424_v38 }
  0xf8   : > { %1327 = vperm.xlu1 %2890, %v3152_v13   ;;  %v922_v33 = vadd.f32 %v3535_v17, %v746_v59  ;;  %vm1530_vm11 = vcmp.eq.s32.totalorder %v3463_v50, %v3424_v38  ;;  %v2616_v17 = vsel %vm1005_vm8, 1.0, %v3050_v1  ;;  %v2617_v25 = vsel %vm1006_vm9, 1.0, %v3050_v1 }
  0xf9   : > { %v752_v37 = vadd.f32 %v3511_v58, %v576_v0  ;;  %vm1356_vm13 = vcmp.eq.s32.totalorder %v3463_v50, %v3436_v41  ;;  %vm831_vm14 = vcmp.eq.s32.totalorder %v3455_v47, %v3448_v45  ;;  %v1097_v2 = vadd.f32 %v2612_v48, %v921_v26 }
  0xfa   : > { %v1098_v6 = vadd.f32 %v2613_v30, %v922_v33  ;;  %v1275_v38 = vadd.f32 %v2646_v7, %v1099_v44  ;;  %v1276_v4 = vadd.f32 %v2647_v39, %v1100_v23  ;;  %v2708_v34 = vsel %vm1529_vm10, 1.0, %v3050_v1 }
  0xfb   : > { %v3618_v53 = vpop.permute.xlu1 %1139  ;;  %v3620_v20 = vpop.permute.xlu0 %1497  ;;  %v5053_v46 = vmov 7   ;;  %v2709_v59 = vsel %vm1530_vm11, 1.0, %v3050_v1  ;;  %v1101_v60 = vadd.f32 %v2616_v17, %v925_v29  ;;  %v1102_v58 = vadd.f32 %v2617_v25, %v926_v32 }
  0xfc   : > { %2891 = vset.pattern.permute.xlu1 %v5051_v27  ;;  %vm1008_vm15 = vcmp.eq.s32.totalorder %v3463_v50, %v3434_v40  ;;  %v2618_v0 = vsel %vm1007_vm12, 1.0, %v3050_v1  ;;  %vm1355_vm0 = vcmp.eq.s32.totalorder %v3455_v47, %v3436_v41  ;;  %v2679_v48 = vsel %vm1356_vm13, 1.0, %v3050_v1 }
  0xfd   : > { %456 = vperm.xlu1 %2891, %v3158_v14   ;;  %v2586_v30 = vsel %vm831_vm14, 1.0, %v3050_v1  ;;  %vm1532_vm1 = vcmp.eq.s32.totalorder %v3463_v50, %v3459_v49  ;;  %v1273_v29 = vadd.f32 %v2644_v56, %v1097_v2  ;;  %v2619_v44 = vsel %vm1008_vm15, 1.0, %v3050_v1 }
  0xfe   : > { %vm832_vm4 = vcmp.eq.s32.totalorder %v3463_v50, %v3448_v45  ;;  %v2678_v26 = vsel %vm1355_vm0, 1.0, %v3050_v1  ;;  %vm1531_vm5 = vcmp.eq.s32.totalorder %v3455_v47, %v3459_v49  ;;  %v5054_v33 = vmov 2  }
  0xff   : > { %v3640_v55 = vpop.permute.xlu0 %1506  ;;  %v1452_v7 = vadd.f32 %v2679_v48, %v1276_v4  ;;  %v927_v39 = vadd.f32 %v2586_v30, %v751_v19  ;;  %v2711_v45 = vsel %vm1532_vm1, 1.0, %v3050_v1  ;;  %vm1358_vm6 = vcmp.eq.s32.totalorder %v3463_v50, %v3505_v57 }
 0x100   : > { %v3647_v11 = vpop.permute.xlu1 %617  ;;  %v2587_v17 = vsel %vm832_vm4, 1.0, %v3050_v1  ;;  %v1277_v19 = vadd.f32 %v2648_v15, %v1101_v60  ;;  %v1278_v4 = vadd.f32 %v2649_v35, %v1102_v58  ;;  %vm1534_vm8 = vcmp.eq.s32.totalorder %v3463_v50, %v3592_v9 }
 0x101   : > { %2892 = vset.pattern.permute.xlu1 %v5052_v12  ;;  %v1451_v49 = vadd.f32 %v2678_v26, %v1275_v38  ;;  %vm483_vm9 = vcmp.eq.s32.totalorder %v3455_v47, %v3466_v51  ;;  %v2681_v48 = vsel %vm1358_vm6, 1.0, %v3050_v1  ;;  %v928_v57 = vadd.f32 %v2587_v17, %v752_v37 }
 0x102   : > { %805 = vperm.xlu1 %2892, %v3192_v21   ;;  %vm1533_vm10 = vcmp.eq.s32.totalorder %v3455_v47, %v3592_v9  ;;  %v1103_v15 = vadd.f32 %v2618_v0, %v927_v39  ;;  %vm484_vm11 = vcmp.eq.s32.totalorder %v3463_v50, %v3466_v51  ;;  %vm307_vm12 = vcmp.eq.s32.totalorder %v3455_v47, %v3553_v63 }
 0x103   : > { %v3665_v5 = vpop.permute.xlu0 %1515  ;;  %v2713_v35 = vsel %vm1534_vm8, 1.0, %v3050_v1  ;;  %v1454_v60 = vadd.f32 %v2681_v48, %v1278_v4  ;;  %vm1183_vm13 = vcmp.eq.s32.totalorder %v3455_v47, %v3618_v53  ;;  %vm1184_vm14 = vcmp.eq.s32.totalorder %v3463_v50, %v3618_v53 }
 0x104   : > { %vm308_vm15 = vcmp.eq.s32.totalorder %v3463_v50, %v3553_v63  ;;  %vm659_vm0 = vcmp.eq.s32.totalorder %v3455_v47, %v3647_v11  ;;  %v2494_v0 = vsel %vm307_vm12, 1.0, %v3050_v1  ;;  %v2650_v63 = vsel %vm1183_vm13, 1.0, %v3050_v1 }
 0x105   : > { %v3678_v61 = vpop.permute.xlu1 %966  ;;  %v5055_v9 = vmov 0   ;;  %v2495_v26 = vsel %vm308_vm15, 1.0, %v3050_v1  ;;  %vm835_vm4 = vcmp.eq.s32.totalorder %v3455_v47, %v3352_v62  ;;  %v1279_v51 = vadd.f32 %v2650_v63, %v1103_v15 }
 0x106   : > { %2893 = vset.pattern.permute.xlu1 %v5053_v46  ;;  %v2590_v4 = vsel %vm835_vm4, 1.0, %v3050_v1  ;;  %vm1187_vm8 = vcmp.eq.s32.totalorder %v3455_v47, %v3416_v36  ;;  %vm305_vm12 = vcmp.eq.s32.totalorder %v3455_v47, %v3379_v24  ;;  %vm306_vm13 = vcmp.eq.s32.totalorder %v3463_v50, %v3379_v24 }
 0x107   : > { %1503 = vperm.xlu1 %2893, %v3152_v13   ;;  %v1274_v13 = vadd.f32 %v2645_v43, %v1098_v6  ;;  %v2710_v6 = vsel %vm1531_vm5, 1.0, %v3050_v1  ;;  %vm836_vm5 = vcmp.eq.s32.totalorder %v3463_v50, %v3352_v62  ;;  %vm482_vm15 = vcmp.eq.s32.totalorder %v3463_v50, %v3442_v42 }
 0x108   : > { %v1307_v40 = vpop.permute.xlu0 %1306  ;;  %v1627_v37 = vadd.f32 %v2710_v6, %v1451_v49  ;;  %v2591_v62 = vsel %vm836_vm5, 1.0, %v3050_v1  ;;  %v2493_v24 = vsel %vm306_vm13, 1.0, %v3050_v1  ;;  %v2525_v63 = vsel %vm482_vm15, 1.0, %v3050_v1 }
 0x109   : > { %vm1353_vm2 = vcmp.eq.s32.totalorder %v3455_v47, %v1307_v40  ;;  %vm1354_vm3 = vcmp.eq.s32.totalorder %v3463_v50, %v1307_v40  ;;  %v1628_v40 = vadd.f32 %v2711_v45, %v1452_v7  ;;  %vm1009_vm4 = vcmp.eq.s32.totalorder %v3455_v47, %v3678_v61 }
 0x10a   : > { %v2676_v41 = vsel %vm1353_vm2, 1.0, %v3050_v1  ;;  %v2677_v23 = vsel %vm1354_vm3, 1.0, %v3050_v1  ;;  %v3706_v32 = vpop.permute.xlu1 %268  ;;  %vm660_vm3 = vcmp.eq.s32.totalorder %v3463_v50, %v3647_v11  ;;  %vm1010_vm5 = vcmp.eq.s32.totalorder %v3463_v50, %v3678_v61 }
 0x10b   : > { %v1449_v56 = vadd.f32 %v2676_v41, %v1273_v29  ;;  %2894 = vset.pattern.permute.xlu1 %v5054_v33  ;;  %v1450_v43 = vadd.f32 %v2677_v23, %v1274_v13  ;;  %v1630_v29 = vadd.f32 %v2713_v35, %v1454_v60  ;;  %v1104_v13 = vadd.f32 %v2619_v44, %v928_v57 }
 0x10c   : > { %632 = vperm.xlu1 %2894, %v3158_v14   ;;  %v1316_v38 = vpop.permute.xlu0 %1315  ;;  %v2651_v41 = vsel %vm1184_vm14, 1.0, %v3050_v1  ;;  %v2527_v23 = vsel %vm484_vm11, 1.0, %v3050_v1  ;;  %v2559_v45 = vsel %vm660_vm3, 1.0, %v3050_v1  ;;  %vm481_vm14 = vcmp.eq.s32.totalorder %v3455_v47, %v3442_v42 }
 0x10d   : > { %v1626_v25 = vadd.f32 %v2709_v59, %v1450_v43  ;;  %v1625_v2 = vadd.f32 %v2708_v34, %v1449_v56  ;;  %v2680_v34 = vsel %vm1357_vm7, 1.0, %v3050_v1  ;;  %v2526_v59 = vsel %vm483_vm9, 1.0, %v3050_v1 }
 0x10e   : > { %v1453_v58 = vadd.f32 %v2680_v34, %v1277_v19  ;;  %vm1359_vm1 = vcmp.eq.s32.totalorder %v3455_v47, %v1316_v38  ;;  %vm1360_vm2 = vcmp.eq.s32.totalorder %v3463_v50, %v1316_v38  ;;  %v2558_v43 = vsel %vm659_vm0, 1.0, %v3050_v1 }
 0x10f   : > { %1753 = vmatprep.mubr.f32.mxu0 %v1626_v25  ;;  %v3728_v30 = vpop.permute.xlu1 %444  ;;  %v579_v44 = vadd.f32 %v2526_v59, %v2494_v0  ;;  %v2682_v11 = vsel %vm1359_vm1, 1.0, %v3050_v1  ;;  %v2683_v7 = vsel %vm1360_vm2, 1.0, %v3050_v1  ;;  %v1280_v39 = vadd.f32 %v2651_v41, %v1104_v13 }
 0x110   : > { %2895 = vset.pattern.permute.xlu1 %v5050_v8  ;;  %1754 = vmatmul.mubr.f32.vlgmr.msra.gmra.mxu0 %v1625_v2  ;;  %v580_v17 = vadd.f32 %v2527_v23, %v2495_v26  ;;  %v1455_v6 = vadd.f32 %v2682_v11, %v1279_v51  ;;  %vm1188_vm9 = vcmp.eq.s32.totalorder %v3463_v50, %v3416_v36  ;;  %v2524_v42 = vsel %vm481_vm14, 1.0, %v3050_v1 }
 0x111   : > { %1330 = vperm.xlu1 %2895, %v3134_v10   ;;  %1758 = vmatprep.mubr.f32.mxu0 %v1628_v40  ;;  %v2712_v10 = vsel %vm1533_vm10, 1.0, %v3050_v1  ;;  %v755_v25 = vadd.f32 %v2558_v43, %v579_v44  ;;  %v1456_v19 = vadd.f32 %v2683_v7, %v1280_v39  ;;  %v2655_v59 = vsel %vm1188_vm9, 1.0, %v3050_v1  ;;  %v3842_v43 = vld [vmem:[%s3105_s24 + $0x50] sm:$0xff] }
 0x112   : > { %v1629_v56 = vadd.f32 %v2712_v10, %v1453_v58  ;;  %v756_v49 = vadd.f32 %v2559_v45, %v580_v17  ;;  %vm657_vm0 = vcmp.eq.s32.totalorder %v3455_v47, %v3470_v54  ;;  %vm658_vm1 = vcmp.eq.s32.totalorder %v3463_v50, %v3470_v54 }
 0x113   : > { %v931_v15 = vadd.f32 %v2590_v4, %v755_v25  ;;  %vm833_vm2 = vcmp.eq.s32.totalorder %v3455_v47, %v3586_v31  ;;  %vm834_vm3 = vcmp.eq.s32.totalorder %v3463_v50, %v3586_v31  ;;  %v2556_v41 = vsel %vm657_vm0, 1.0, %v3050_v1 }
 0x114   : > { %1759 = vmatmul.mubr.f32.gmra.mxu0 %v1627_v37  ;;  %v3759_v53 = vpop.permute.xlu1 %1142  ;;  %v932_v38 = vadd.f32 %v2591_v62, %v756_v49  ;;  %v5056_v37 = vmov 5   ;;  %v2557_v54 = vsel %vm658_vm1, 1.0, %v3050_v1  ;;  %v578_v26 = vadd.f32 %v2525_v63, %v2493_v24  ;;  %v1899_v63 = vld [vmem:[%s5011_s3 + $0xd0] sm:$0xff] }
 0x115   : > { %2896 = vset.pattern.permute.xlu1 %v5055_v9  ;;  %1763 = vmatprep.mubr.f32.mxu0 %v1630_v29  ;;  %v2589_v31 = vsel %vm834_vm3, 1.0, %v3050_v1  ;;  %v2620_v61 = vsel %vm1009_vm4, 1.0, %v3050_v1  ;;  %v2621_v7 = vsel %vm1010_vm5, 1.0, %v3050_v1  ;;  %vm1540_vm13 = vcmp.eq.s32.totalorder %v3463_v50, %v3620_v20 }
 0x116   : > { %283 = vperm.xlu1 %2896, %v3178_v18   ;;  %v754_v11 = vadd.f32 %v2557_v54, %v578_v26  ;;  %v1897_v26 = vld [vmem:[%s5011_s3 + $0xc0] sm:$0xff]  ;;  %vm486_vm0 = vcmp.eq.s32.totalorder %v3463_v50, %v3728_v30  ;;  %vm485_vm1 = vcmp.eq.s32.totalorder %v3455_v47, %v3728_v30  ;;  %vm309_vm4 = vcmp.eq.s32.totalorder %v3455_v47, %v3706_v32 }
 0x117   : > { %v2529_v30 = vsel %vm486_vm0, 1.0, %v3050_v1 }
 0x118   : > { %1764 = vmatmul.mubr.f32.gmra.mxu0 %v1629_v56  ;;  %v2588_v56 = vsel %vm833_vm2, 1.0, %v3050_v1  ;;  %v930_v39 = vadd.f32 %v2589_v31, %v754_v11  ;;  %v3920_v11 = vpop.permute.xlu0 %1324  ;;  %vm310_vm2 = vcmp.eq.s32.totalorder %v3463_v50, %v3706_v32 }
 0x119   : > { %v1492_v2 = vpop.permute.xlu1 %1491 }
 0x11a   : > { %vm1535_vm6 = vcmp.eq.s32.totalorder %v3455_v47, %v1492_v2  ;;  %vm1536_vm7 = vcmp.eq.s32.totalorder %v3463_v50, %v1492_v2  ;;  %2897 = vset.pattern.permute.xlu1 %v5052_v12  ;;  %v1106_v2 = vadd.f32 %v2621_v7, %v930_v39  ;;  %v3927_v7 = vld [vmem:[%s3105_s24 + $0x58] sm:$0xff] }
 0x11b   : > { %v2714_v48 = vsel %vm1535_vm6, 1.0, %v3050_v1  ;;  %v2715_v40 = vsel %vm1536_vm7, 1.0, %v3050_v1  ;;  %808 = vperm.xlu1 %2897, %v3158_v14   ;;  %v2654_v14 = vsel %vm1187_vm8, 1.0, %v3050_v1  ;;  %vm1185_vm6 = vcmp.eq.s32.totalorder %v3455_v47, %v3759_v53  ;;  %v1892_v39 = vld [vmem:[%s5011_s3 + $0x98] sm:$0xff] }
 0x11c   : > { %v1632_v57 = vadd.f32 %v2715_v40, %v1456_v19  ;;  %v1631_v34 = vadd.f32 %v2714_v48, %v1455_v6  ;;  %vm1186_vm7 = vcmp.eq.s32.totalorder %v3463_v50, %v3759_v53  ;;  %v2652_v17 = vsel %vm1185_vm6, 1.0, %v3050_v1 }
 0x11d   : > { %v2653_v25 = vsel %vm1186_vm7, 1.0, %v3050_v1 }
 0x11e   : > { %1768 = vmatprep.mubr.f32.mxu0 %v1632_v57  ;;  %v970_v35 = vpop.permute.xlu1 %969  ;;  %v1282_v49 = vadd.f32 %v2653_v25, %v1106_v2  ;;  %v1891_v25 = vld [vmem:[%s5011_s3 + $0x90] sm:$0xff]  ;;  %v1889_v2 = vld [vmem:[%s5011_s3 + $0x80] sm:$0xff] }
 0x11f   : > { %vm1011_vm10 = vcmp.eq.s32.totalorder %v3455_v47, %v970_v35  ;;  %vm1012_vm11 = vcmp.eq.s32.totalorder %v3463_v50, %v970_v35  ;;  %2898 = vset.pattern.permute.xlu1 %v5056_v37  ;;  %1769 = vmatmul.mubr.f32.gmra.mxu0 %v1631_v34 }
 0x120   : > { %v2622_v60 = vsel %vm1011_vm10, 1.0, %v3050_v1  ;;  %v2623_v58 = vsel %vm1012_vm11, 1.0, %v3050_v1  ;;  %1157 = vperm.xlu1 %2898, %v3192_v21   ;;  %v2492_v21 = vsel %vm305_vm12, 1.0, %v3050_v1  ;;  %vm1539_vm12 = vcmp.eq.s32.totalorder %v3455_v47, %v3620_v20 }
 0x121   : > { %v1107_v36 = vadd.f32 %v2622_v60, %v931_v15  ;;  %v1108_v10 = vadd.f32 %v2623_v58, %v932_v38  ;;  %v577_v23 = vadd.f32 %v2524_v42, %v2492_v21  ;;  %v1902_v60 = vld [vmem:[%s5011_s3 + $0xe8] sm:$0xff]  ;;  %v2718_v20 = vsel %vm1539_vm12, 1.0, %v3050_v1 }
 0x122   : > { %v3036_v42 = vld [vmem:[%s3105_s24 + $0x48] sm:$0xff]  ;;  %vm489_vm12 = vcmp.eq.s32.totalorder %v3455_v47, %v3487_v52 }
 0x123   : > { %v1319_v0 = vpop.permute.xlu1 %1318  ;;  %v3812_v29 = vadd.f32 %v2654_v14, %v1107_v36  ;;  %v3814_v13 = vadd.f32 %v2655_v59, %v1108_v10  ;;  %v753_v44 = vadd.f32 %v2556_v41, %v577_v23  ;;  %v1904_v14 = vld [vmem:[%s5011_s3 + $0xf8] sm:$0xff]  ;;  %v1903_v59 = vld [vmem:[%s5011_s3 + $0xf0] sm:$0xff]  ;;  %v1901_v36 = vld [vmem:[%s5011_s3 + $0xe0] sm:$0xff] }
 0x124   : > { %2899 = vset.pattern.permute.xlu1 %v5054_v33  ;;  %vm1361_vm8 = vcmp.eq.s32.totalorder %v3455_v47, %v1319_v0  ;;  %vm1362_vm9 = vcmp.eq.s32.totalorder %v3463_v50, %v1319_v0  ;;  %1917 = vmatprep.subr.mxu1 %v1904_v14  ;;  %v1900_v10 = vld [vmem:[%s5011_s3 + $0xd8] sm:$0xff]  ;;  %v2719_v0 = vsel %vm1540_vm13, 1.0, %v3050_v1  ;;  %v1898_v23 = vld [vmem:[%s5011_s3 + $0xc8] sm:$0xff]  ;;  %vm490_vm13 = vcmp.eq.s32.totalorder %v3463_v50, %v3487_v52 }
 0x125   : > { %635 = vperm.xlu1 %2899, %v3178_v18   ;;  %v929_v51 = vadd.f32 %v2588_v56, %v753_v44  ;;  %v2684_v6 = vsel %vm1361_vm8, 1.0, %v3050_v1  ;;  %v2685_v19 = vsel %vm1362_vm9, 1.0, %v3050_v1  ;;  %1918 = vmatpush1.msra.mxu1 %v1903_v59  ;;  %v1881_v59 = vld [vmem:[%s5011_s3 + $0x40] sm:$0xff]  ;;  %vm1014_vm8 = vcmp.eq.s32.totalorder %v3463_v50, %v3440_v28 }
 0x126   : > { %v1458_v62 = vadd.f32 %v2685_v19, %v1282_v49  ;;  %1919 = vmatprep.subr.mxu1 %v1902_v60  ;;  %v1888_v19 = vld [vmem:[%s5011_s3 + $0x78] sm:$0xff]  ;;  %vm1013_vm9 = vcmp.eq.s32.totalorder %v3455_v47, %v3440_v28 }
 0x127   : > { %v1105_v53 = vadd.f32 %v2620_v61, %v929_v51  ;;  %1920 = vmatpush1.msra.mxu1 %v1901_v36  ;;  %v1894_v61 = vld [vmem:[%s5011_s3 + $0xa8] sm:$0xff]  ;;  %v1893_v51 = vld [vmem:[%s5011_s3 + $0xa0] sm:$0xff]  ;;  %v1880_v60 = vld [vmem:[%s5011_s3 + $0x38] sm:$0xff] }
 0x128   : > { %v3832_v18 = vpop.permute.xlu1 %447  ;;  %1921 = vmatprep.subr.mxu1 %v1900_v10  ;;  %v1878_v36 = vld [vmem:[%s5011_s3 + $0x28] sm:$0xff] }
 0x129   : > { %2900 = vset.pattern.permute.xlu1 %v5048_v16  ;;  %v1281_v4 = vadd.f32 %v2652_v17, %v1105_v53  ;;  %1922 = vmatpush1.msra.mxu1 %v1899_v63  ;;  %v1890_v53 = vld [vmem:[%s5011_s3 + $0x88] sm:$0xff]  ;;  %v1873_v63 = vld [vmem:[%s5011_s3] sm:$0xff] }
 0x12a   : > { %984 = vperm.xlu1 %2900, %v3842_v43   ;;  %1923 = vmatprep.subr.mxu1 %v1898_v23  ;;  %v2496_v23 = vsel %vm309_vm4, 1.0, %v3050_v1  ;;  %vm841_vm4 = vcmp.eq.s32.totalorder %v3455_v47, %v3359_v3 }
 0x12b   : > { %v1457_v40 = vadd.f32 %v2684_v6, %v1281_v4  ;;  %1924 = vmatpush1.msra.mxu1 %v1897_v26  ;;  %v3948_v6 = vpop.permute.xlu0 %1333  ;;  %v1887_v4 = vld [vmem:[%s5011_s3 + $0x70] sm:$0xff] }
 0x12d   : > { %v3853_v45 = vpop.permute.xlu1 %796 }
 0x12e   : > { %2901 = vset.pattern.permute.xlu1 %v5055_v9  ;;  %vm838_vm6 = vcmp.eq.s32.totalorder %v3463_v50, %v3853_v45  ;;  %vm837_vm7 = vcmp.eq.s32.totalorder %v3455_v47, %v3853_v45 }
 0x12f   : > { %286 = vperm.xlu1 %2901, %v3198_v22   ;;  %v3867_v22 = vld [vmem:[%s3105_s24 + $0x60] sm:$0xff]  ;;  %v2592_v45 = vsel %vm837_vm7, 1.0, %v3050_v1 }
 0x132   : > { %v1495_v48 = vpop.permute.xlu1 %1494 }
 0x133   : > { %vm1537_vm10 = vcmp.eq.s32.totalorder %v3455_v47, %v1495_v48  ;;  %vm1538_vm11 = vcmp.eq.s32.totalorder %v3463_v50, %v1495_v48  ;;  %2902 = vset.pattern.permute.xlu1 %v5051_v27  ;;  %v1886_v48 = vld [vmem:[%s5011_s3 + $0x68] sm:$0xff] }
 0x134   : > { %v2716_v57 = vsel %vm1537_vm10, 1.0, %v3050_v1  ;;  %v2717_v34 = vsel %vm1538_vm11, 1.0, %v3050_v1  ;;  %462 = vperm.xlu1 %2902, %v3867_v22  }
 0x135   : > { %v1634_v15 = vadd.f32 %v2717_v34, %v1458_v62  ;;  %v1633_v35 = vadd.f32 %v2716_v57, %v1457_v40  ;;  %v1885_v40 = vld [vmem:[%s5011_s3 + $0x60] sm:$0xff]  ;;  %v1884_v62 = vld [vmem:[%s5011_s3 + $0x58] sm:$0xff]  ;;  %v3970_v57 = vld [vmem:[%s3105_s24 + $0x68] sm:$0xff]  ;;  %v3973_v34 = vpop.permute.xlu0 %1342 }
 0x137   : > { %1773 = vmatprep.mubr.f32.mxu0 %v1634_v15  ;;  %v3870_v38 = vpop.permute.xlu1 %623  ;;  %v1883_v15 = vld [vmem:[%s5011_s3 + $0x50] sm:$0xff] }
 0x138   : > { %2903 = vset.pattern.permute.xlu1 %v5056_v37  ;;  %1774 = vmatmul.mubr.f32.gmra.mxu0 %v1633_v35  ;;  %v1882_v35 = vld [vmem:[%s5011_s3 + $0x48] sm:$0xff] }
 0x139   : > { %1160 = vperm.xlu1 %2903, %v3842_v43   ;;  %v621_v10 = vpop.permute.xlu0 %620 }
 0x13a   : > { %vm662_vm3 = vcmp.eq.s32.totalorder %v3463_v50, %v621_v10  ;;  %vm661_vm5 = vcmp.eq.s32.totalorder %v3455_v47, %v621_v10 }
 0x13c   : > { %v1322_v58 = vpop.permute.xlu1 %1321 }
 0x13d   : > { %vm1363_vm14 = vcmp.eq.s32.totalorder %v3455_v47, %v1322_v58  ;;  %vm1364_vm15 = vcmp.eq.s32.totalorder %v3463_v50, %v1322_v58  ;;  %2904 = vset.pattern.permute.xlu1 %v5053_v46  ;;  %v1879_v58 = vld [vmem:[%s5011_s3 + $0x30] sm:$0xff] }
 0x13e   : > { %v2686_v21 = vsel %vm1363_vm14, 1.0, %v3050_v1  ;;  %v2687_v24 = vsel %vm1364_vm15, 1.0, %v3050_v1  ;;  %1509 = vperm.xlu1 %2904, %v3036_v42   ;;  %v1874_v42 = vld [vmem:[%s5011_s3 + $0x8] sm:$0xff]  ;;  %vm1366_vm15 = vcmp.eq.s32.totalorder %v3463_v50, %v3920_v11 }
 0x13f   : > { %v1459_v41 = vadd.f32 %v2686_v21, %v3812_v29  ;;  %v1460_v54 = vadd.f32 %v2687_v24, %v3814_v13  ;;  %v1896_v29 = vld [vmem:[%s5011_s3 + $0xb8] sm:$0xff]  ;;  %v1895_v13 = vld [vmem:[%s5011_s3 + $0xb0] sm:$0xff] }
 0x140   : > { %1925 = vmatprep.subr.mxu1 %v1896_v29  ;;  %v1876_v21 = vld [vmem:[%s5011_s3 + $0x18] sm:$0xff]  ;;  %v1875_v24 = vld [vmem:[%s5011_s3 + $0x10] sm:$0xff]  ;;  %v2593_v29 = vsel %vm838_vm6, 1.0, %v3050_v1 }
 0x141   : > { %v3912_v56 = vpop.permute.xlu1 %274  ;;  %v1636_v31 = vadd.f32 %v2719_v0, %v1460_v54  ;;  %v1635_v44 = vadd.f32 %v2718_v20, %v1459_v41  ;;  %1926 = vmatpush1.msra.mxu1 %v1895_v13  ;;  %v1877_v20 = vld [vmem:[%s5011_s3 + $0x20] sm:$0xff]  ;;  %v2528_v41 = vsel %vm485_vm1, 1.0, %v3050_v1  ;;  %v2561_v54 = vsel %vm662_vm3, 1.0, %v3050_v1 }
 0x142   : > { %2905 = vset.pattern.permute.xlu1 %v5048_v16  ;;  %1927 = vmatprep.subr.mxu1 %v1894_v61  ;;  %vm313_vm14 = vcmp.eq.s32.totalorder %v3455_v47, %v3912_v56  ;;  %vm314_vm0 = vcmp.eq.s32.totalorder %v3463_v50, %v3912_v56  ;;  %vm1365_vm1 = vcmp.eq.s32.totalorder %v3455_v47, %v3920_v11  ;;  %v2533_v56 = vsel %vm490_vm13, 1.0, %v3050_v1 }
 0x143   : > { %987 = vperm.xlu1 %2905, %v3927_v7   ;;  %1778 = vmatprep.mubr.f32.mxu0 %v1636_v31  ;;  %v2560_v31 = vsel %vm661_vm5, 1.0, %v3050_v1  ;;  %v2689_v11 = vsel %vm1366_vm15, 1.0, %v3050_v1  ;;  %vm842_vm5 = vcmp.eq.s32.totalorder %v3463_v50, %v3359_v3  ;;  %vm488_vm15 = vcmp.eq.s32.totalorder %v3463_v50, %v3832_v18 }
 0x144   : > { %1779 = vmatmul.mubr.f32.gmra.mxu0 %v1635_v44  ;;  %1928 = vmatpush1.msra.mxu1 %v1893_v51  ;;  %v581_v44 = vadd.f32 %v2528_v41, %v2496_v23  ;;  %v2597_v3 = vsel %vm842_vm5, 1.0, %v3050_v1  ;;  %v5057_v23 = vld [vmem:[#allocation5_spill] sm:$0xff] }
 0x145   : > { %1929 = vmatprep.subr.mxu1 %v1892_v39 }
 0x146   : > { %v3936_v17 = vpop.permute.xlu1 %799  ;;  %1930 = vmatpush1.msra.mxu1 %v1891_v25  ;;  %v757_v61 = vadd.f32 %v2560_v31, %v581_v44  ;;  %v2625_v25 = vsel %vm1014_vm8, 1.0, %v3050_v1  ;;  %vm1193_vm8 = vcmp.eq.s32.totalorder %v3455_v47, %v5057_v23 }
 0x147   : > { %2906 = vset.pattern.permute.xlu1 %v5050_v8  ;;  %1931 = vmatprep.subr.mxu1 %v1890_v53  ;;  %v2660_v44 = vsel %vm1193_vm8, 1.0, %v3050_v1 }
 0x148   : > { %1336 = vperm.xlu1 %2906, %v3842_v43   ;;  %1932 = vmatpush1.msra.mxu1 %v1889_v2  ;;  %v933_v53 = vadd.f32 %v2592_v45, %v757_v61  ;;  %v2624_v2 = vsel %vm1013_vm9, 1.0, %v3050_v1  ;;  %vm1194_vm9 = vcmp.eq.s32.totalorder %v3463_v50, %v5057_v23 }
 0x149   : > { %1933 = vmatprep.subr.mxu1 %v1888_v19 }
 0x14a   : > { %1934 = vmatpush1.msra.mxu1 %v1887_v4  ;;  %v1109_v4 = vadd.f32 %v2624_v2, %v933_v53 }
 0x14b   : > { %v3957_v49 = vpop.permute.xlu1 %1148  ;;  %1935 = vmatprep.subr.mxu1 %v1886_v48  ;;  %v2532_v48 = vsel %vm489_vm12, 1.0, %v3050_v1 }
 0x14c   : > { %2908 = vset.pattern.permute.xlu1 %v5051_v27  ;;  %1936 = vmatpush1.msra.mxu1 %v1885_v40  ;;  %vm1190_vm10 = vcmp.eq.s32.totalorder %v3463_v50, %v3957_v49  ;;  %vm1189_vm11 = vcmp.eq.s32.totalorder %v3455_v47, %v3957_v49  ;;  %v2500_v40 = vsel %vm313_vm14, 1.0, %v3050_v1  ;;  %vm487_vm14 = vcmp.eq.s32.totalorder %v3455_v47, %v3832_v18 }
 0x14d   : > { %465 = vperm.xlu1 %2908, %v3970_v57   ;;  %1937 = vmatprep.subr.mxu1 %v1884_v62  ;;  %v2657_v28 = vsel %vm1190_vm10, 1.0, %v3050_v1  ;;  %v2530_v18 = vsel %vm487_vm14, 1.0, %v3050_v1 }
 0x14e   : > { %1938 = vmatpush1.msra.mxu1 %v1883_v15  ;;  %v2501_v15 = vsel %vm314_vm0, 1.0, %v3050_v1  ;;  %vm663_vm0 = vcmp.eq.s32.totalorder %v3455_v47, %v3870_v38 }
 0x14f   : > { %1939 = vmatprep.subr.mxu1 %v1882_v35 }
 0x150   : > { %v3981_v14 = vpop.permute.xlu1 %626  ;;  %1940 = vmatpush1.msra.mxu1 %v1881_v59  ;;  %v4086_v59 = vld [vmem:[%s3105_s24 + $0x70] sm:$0xff] }
 0x151   : > { %2909 = vset.pattern.permute.xlu1 %v5052_v12  ;;  %1941 = vmatprep.subr.mxu1 %v1880_v60  ;;  %vm666_vm3 = vcmp.eq.s32.totalorder %v3463_v50, %v3981_v14  ;;  %v2688_v60 = vsel %vm1365_vm1, 1.0, %v3050_v1  ;;  %vm664_vm1 = vcmp.eq.s32.totalorder %v3463_v50, %v3870_v38 }
 0x152   : > { %814 = vperm.xlu1 %2909, %v3867_v22   ;;  %1942 = vmatpush1.msra.mxu1 %v1879_v58  ;;  %v585_v58 = vadd.f32 %v2532_v48, %v2500_v40  ;;  %v2565_v52 = vsel %vm666_vm3, 1.0, %v3050_v1  ;;  %vm840_vm3 = vcmp.eq.s32.totalorder %v3463_v50, %v3936_v17  ;;  %v2563_v38 = vsel %vm664_vm1, 1.0, %v3050_v1 }
 0x153   : > { %1943 = vmatprep.subr.mxu1 %v1878_v36  ;;  %v586_v36 = vadd.f32 %v2533_v56, %v2501_v15 }
 0x154   : > { %1944 = vmatpush1.msra.mxu1 %v1877_v20 }
 0x155   : > { %v4002_v0 = vpop.permute.xlu1 %975  ;;  %1945 = vmatprep.subr.mxu1 %v1876_v21 }
 0x156   : > { %2911 = vset.pattern.permute.xlu1 %v5053_v46  ;;  %1946 = vmatpush1.msra.mxu1 %v1875_v24  ;;  %vm1016_vm5 = vcmp.eq.s32.totalorder %v3463_v50, %v4002_v0 }
 0x157   : > { %1512 = vperm.xlu1 %2911, %v3842_v43   ;;  %1947 = vmatprep.subr.mxu1 %v1874_v42  ;;  %v2497_v43 = vsel %vm310_vm2, 1.0, %v3050_v1  ;;  %vm665_vm2 = vcmp.eq.s32.totalorder %v3455_v47, %v3981_v14  ;;  %v2596_v42 = vsel %vm841_vm4, 1.0, %v3050_v1  ;;  %vm1015_vm4 = vcmp.eq.s32.totalorder %v3455_v47, %v4002_v0 }
 0x158   : > { %1948 = vmatpush1.msra.mxu1 %v1873_v63  ;;  %v582_v26 = vadd.f32 %v2529_v30, %v2497_v43  ;;  %v2564_v14 = vsel %vm665_vm2, 1.0, %v3050_v1  ;;  %v762_v30 = vadd.f32 %v2565_v52, %v586_v36  ;;  %vm839_vm2 = vcmp.eq.s32.totalorder %v3455_v47, %v3936_v17 }
 0x159   : > { %v761_v21 = vadd.f32 %v2564_v14, %v585_v58  ;;  %v2594_v56 = vsel %vm839_vm2, 1.0, %v3050_v1  ;;  %v2595_v17 = vsel %vm840_vm3, 1.0, %v3050_v1  ;;  %v2627_v0 = vsel %vm1016_vm5, 1.0, %v3050_v1 }
 0x15a   : > { %v4034_v32 = vpop.permute.xlu1 %277  ;;  %v758_v13 = vadd.f32 %v2561_v54, %v582_v26  ;;  %v938_v31 = vadd.f32 %v2597_v3, %v762_v30 }
 0x15b   : > { %2912 = vset.pattern.permute.xlu1 %v5054_v33  ;;  %vm315_vm2 = vcmp.eq.s32.totalorder %v3455_v47, %v4034_v32  ;;  %vm316_vm3 = vcmp.eq.s32.totalorder %v3463_v50, %v4034_v32 }
 0x15c   : > { %641 = vperm.xlu1 %2912, %v3970_v57   ;;  %v934_v51 = vadd.f32 %v2593_v29, %v758_v13  ;;  %v2661_v29 = vsel %vm1194_vm9, 1.0, %v3050_v1  ;;  %v2502_v32 = vsel %vm315_vm2, 1.0, %v3050_v1 }
 0x15e   : > { %v1110_v19 = vadd.f32 %v2625_v25, %v934_v51  ;;  %v5058_v25 = vld [vmem:[#allocation2_spill] sm:$0xff] }
 0x15f   : > { %v4048_v39 = vpop.permute.xlu1 %453  ;;  %vm311_vm12 = vcmp.eq.s32.totalorder %v3455_v47, %v5058_v25  ;;  %vm312_vm13 = vcmp.eq.s32.totalorder %v3463_v50, %v5058_v25 }
 0x160   : > { %2914 = vset.pattern.permute.xlu1 %v5050_v8  ;;  %v1286_v62 = vadd.f32 %v2657_v28, %v1110_v19  ;;  %v2498_v19 = vsel %vm311_vm12, 1.0, %v3050_v1  ;;  %vm1545_vm12 = vcmp.eq.s32.totalorder %v3455_v47, %v3640_v55  ;;  %vm491_vm14 = vcmp.eq.s32.totalorder %v3455_v47, %v4048_v39 }
 0x161   : > { %1339 = vperm.xlu1 %2914, %v3927_v7   ;;  %v2656_v7 = vsel %vm1189_vm11, 1.0, %v3050_v1  ;;  %v583_v40 = vadd.f32 %v2530_v18, %v2498_v19 }
 0x162   : > { %v1285_v35 = vadd.f32 %v2656_v7, %v1109_v4  ;;  %v1462_v20 = vadd.f32 %v2689_v11, %v1286_v62  ;;  %v2499_v7 = vsel %vm312_vm13, 1.0, %v3050_v1  ;;  %v2531_v4 = vsel %vm488_vm15, 1.0, %v3050_v1 }
 0x163   : > { %v584_v62 = vadd.f32 %v2531_v4, %v2499_v7  ;;  %vm1546_vm13 = vcmp.eq.s32.totalorder %v3463_v50, %v3640_v55  ;;  %vm492_vm15 = vcmp.eq.s32.totalorder %v3463_v50, %v4048_v39 }
 0x164   : > { %v4072_v49 = vpop.permute.xlu1 %1151  ;;  %v1461_v24 = vadd.f32 %v2688_v60, %v1285_v35  ;;  %v2626_v35 = vsel %vm1015_vm4, 1.0, %v3050_v1 }
 0x165   : > { %2915 = vset.pattern.permute.xlu1 %v5055_v9  ;;  %v760_v15 = vadd.f32 %v2563_v38, %v584_v62 }
 0x166   : > { %292 = vperm.xlu1 %2915, %v4086_v59  }
 0x167   : > { %v936_v14 = vadd.f32 %v2595_v17, %v760_v15 }
 0x169   : > { %v1501_v10 = vpop.permute.xlu1 %1500 }
 0x16a   : > { %vm1541_vm6 = vcmp.eq.s32.totalorder %v3455_v47, %v1501_v10  ;;  %vm1542_vm7 = vcmp.eq.s32.totalorder %v3463_v50, %v1501_v10  ;;  %2917 = vset.pattern.permute.xlu1 %v5052_v12  ;;  %v937_v12 = vadd.f32 %v2596_v42, %v761_v21 }
 0x16b   : > { %v2720_v63 = vsel %vm1541_vm6, 1.0, %v3050_v1  ;;  %v2721_v41 = vsel %vm1542_vm7, 1.0, %v3050_v1  ;;  %817 = vperm.xlu1 %2917, %v3970_v57   ;;  %vm1191_vm6 = vcmp.eq.s32.totalorder %v3455_v47, %v4072_v49  ;;  %vm1192_vm7 = vcmp.eq.s32.totalorder %v3463_v50, %v4072_v49 }
 0x16c   : > { %v1638_v43 = vadd.f32 %v2721_v41, %v1462_v20  ;;  %v1637_v54 = vadd.f32 %v2720_v63, %v1461_v24  ;;  %v2658_v52 = vsel %vm1191_vm6, 1.0, %v3050_v1  ;;  %v2659_v36 = vsel %vm1192_vm7, 1.0, %v3050_v1  ;;  %v4168_v20 = vld [vmem:[%s3105_s24 + $0x78] sm:$0xff] }
 0x16d   : > { %v1112_v49 = vadd.f32 %v2627_v0, %v936_v14 }
 0x16e   : > { %1783 = vmatprep.mubr.f32.mxu0 %v1638_v43  ;;  %v979_v26 = vpop.permute.xlu1 %978 }
 0x16f   : > { %vm1017_vm10 = vcmp.eq.s32.totalorder %v3455_v47, %v979_v26  ;;  %vm1018_vm11 = vcmp.eq.s32.totalorder %v3463_v50, %v979_v26  ;;  %2918 = vset.pattern.permute.xlu1 %v5056_v37  ;;  %1784 = vmatmul.mubr.f32.gmra.mxu0 %v1637_v54  ;;  %v1288_v30 = vadd.f32 %v2659_v36, %v1112_v49  ;;  %v2724_v26 = vsel %vm1545_vm12, 1.0, %v3050_v1 }
 0x170   : > { %v2628_v13 = vsel %vm1017_vm10, 1.0, %v3050_v1  ;;  %v2629_v45 = vsel %vm1018_vm11, 1.0, %v3050_v1  ;;  %1166 = vperm.xlu1 %2918, %v3867_v22  }
 0x171   : > { %v1113_v61 = vadd.f32 %v2628_v13, %v937_v12  ;;  %v1114_v51 = vadd.f32 %v2629_v45, %v938_v31  ;;  %v2725_v31 = vsel %vm1546_vm13, 1.0, %v3050_v1  ;;  %v2535_v13 = vsel %vm492_vm15, 1.0, %v3050_v1 }
 0x173   : > { %v1328_v53 = vpop.permute.xlu1 %1327  ;;  %v4124_v2 = vadd.f32 %v2660_v44, %v1113_v61  ;;  %v4126_v28 = vadd.f32 %v2661_v29, %v1114_v51  ;;  %v630_v44 = vpop.permute.xlu0 %629  ;;  %v2534_v29 = vsel %vm491_vm14, 1.0, %v3050_v1  ;;  %v2503_v51 = vsel %vm316_vm3, 1.0, %v3050_v1 }
 0x174   : > { %2920 = vset.pattern.permute.xlu1 %v5054_v33  ;;  %v2562_v33 = vsel %vm663_vm0, 1.0, %v3050_v1  ;;  %vm1367_vm8 = vcmp.eq.s32.totalorder %v3455_v47, %v1328_v53  ;;  %vm1368_vm9 = vcmp.eq.s32.totalorder %v3463_v50, %v1328_v53  ;;  %vm667_vm4 = vcmp.eq.s32.totalorder %v3455_v47, %v630_v44 }
 0x175   : > { %644 = vperm.xlu1 %2920, %v4086_v59   ;;  %v759_v11 = vadd.f32 %v2562_v33, %v583_v40  ;;  %v2690_v21 = vsel %vm1367_vm8, 1.0, %v3050_v1  ;;  %v2691_v24 = vsel %vm1368_vm9, 1.0, %v3050_v1  ;;  %vm668_vm5 = vcmp.eq.s32.totalorder %v3463_v50, %v630_v44  ;;  %v5059_v33 = vld [vmem:[#allocation7_spill] sm:$0xff] }
 0x176   : > { %v1464_v3 = vadd.f32 %v2691_v24, %v1288_v30  ;;  %v587_v19 = vadd.f32 %v2534_v29, %v2502_v32  ;;  %v588_v7 = vadd.f32 %v2535_v13, %v2503_v51  ;;  %vm1019_vm8 = vcmp.eq.s32.totalorder %v3455_v47, %v5059_v33 }
 0x177   : > { %v935_v60 = vadd.f32 %v2594_v56, %v759_v11  ;;  %vm1020_vm9 = vcmp.eq.s32.totalorder %v3463_v50, %v5059_v33  ;;  %v2630_v17 = vsel %vm1019_vm8, 1.0, %v3050_v1  ;;  %v5062_v33 = vld [vmem:[#allocation3_spill] sm:$0xff] }
 0x178   : > { %v4144_v48 = vpop.permute.xlu1 %456  ;;  %v2631_v11 = vsel %vm1020_vm9, 1.0, %v3050_v1 }
 0x179   : > { %2921 = vset.pattern.permute.xlu1 %v5048_v16  ;;  %v1111_v10 = vadd.f32 %v2626_v35, %v935_v60 }
 0x17a   : > { %993 = vperm.xlu1 %2921, %v3970_v57  }
 0x17b   : > { %v1287_v42 = vadd.f32 %v2658_v52, %v1111_v10 }
 0x17d   : > { %v4162_v58 = vpop.permute.xlu1 %805  ;;  %v1463_v41 = vadd.f32 %v2690_v21, %v1287_v42  ;;  %v4251_v42 = vpop.permute.xlu0 %638 }
 0x17e   : > { %2923 = vset.pattern.permute.xlu1 %v5055_v9  ;;  %vm843_vm6 = vcmp.eq.s32.totalorder %v3455_v47, %v4162_v58  ;;  %vm844_vm7 = vcmp.eq.s32.totalorder %v3463_v50, %v4162_v58 }
 0x17f   : > { %295 = vperm.xlu1 %2923, %v4168_v20   ;;  %v2598_v18 = vsel %vm843_vm6, 1.0, %v3050_v1  ;;  %v2599_v4 = vsel %vm844_vm7, 1.0, %v3050_v1 }
 0x182   : > { %v1504_v63 = vpop.permute.xlu1 %1503 }
 0x183   : > { %vm1543_vm10 = vcmp.eq.s32.totalorder %v3455_v47, %v1504_v63  ;;  %vm1544_vm11 = vcmp.eq.s32.totalorder %v3463_v50, %v1504_v63  ;;  %2924 = vset.pattern.permute.xlu1 %v5051_v27 }
 0x184   : > { %v2722_v9 = vsel %vm1543_vm10, 1.0, %v3050_v1  ;;  %v2723_v43 = vsel %vm1544_vm11, 1.0, %v3050_v1  ;;  %471 = vperm.xlu1 %2924, %v4168_v20   ;;  %vm1371_vm10 = vcmp.eq.s32.totalorder %v3455_v47, %v3948_v6  ;;  %vm1372_vm11 = vcmp.eq.s32.totalorder %v3463_v50, %v3948_v6 }
 0x185   : > { %v1640_v54 = vadd.f32 %v2723_v43, %v1464_v3  ;;  %v1639_v23 = vadd.f32 %v2722_v9, %v1463_v41  ;;  %v2694_v60 = vsel %vm1371_vm10, 1.0, %v3050_v1  ;;  %v2695_v14 = vsel %vm1372_vm11, 1.0, %v3050_v1  ;;  %v4257_v41 = vpop.permute.xlu0 %647 }
 0x187   : > { %1788 = vmatprep.mubr.f32.mxu0 %v1640_v54  ;;  %v4179_v12 = vpop.permute.xlu1 %632  ;;  %v5060_v54 = vld [vmem:[#allocation9_spill] sm:$0xff] }
 0x188   : > { %2925 = vset.pattern.permute.xlu1 %v5056_v37  ;;  %1789 = vmatmul.mubr.f32.gmra.mxu0 %v1639_v23  ;;  %vm495_vm2 = vcmp.eq.s32.totalorder %v3455_v47, %v5060_v54  ;;  %vm496_vm3 = vcmp.eq.s32.totalorder %v3463_v50, %v5060_v54 }
 0x189   : > { %1169 = vperm.xlu1 %2925, %v3970_v57   ;;  %v2538_v23 = vsel %vm495_vm2, 1.0, %v3050_v1  ;;  %v812_v44 = vpop.permute.xlu0 %811  ;;  %vm318_vm2 = vcmp.eq.s32.totalorder %v3463_v50, %v5062_v33 }
 0x18a   : > { %vm847_vm8 = vcmp.eq.s32.totalorder %v3455_v47, %v812_v44  ;;  %vm848_vm9 = vcmp.eq.s32.totalorder %v3463_v50, %v812_v44 }
 0x18b   : > { %v2602_v51 = vsel %vm847_vm8, 1.0, %v3050_v1  ;;  %vm673_vm8 = vcmp.eq.s32.totalorder %v3455_v47, %v4251_v42 }
 0x18c   : > { %v1331_v27 = vpop.permute.xlu1 %1330 }
 0x18d   : > { %vm1369_vm0 = vcmp.eq.s32.totalorder %v3455_v47, %v1331_v27  ;;  %vm1370_vm1 = vcmp.eq.s32.totalorder %v3463_v50, %v1331_v27  ;;  %2926 = vset.pattern.permute.xlu1 %v5053_v46  ;;  %v2539_v27 = vsel %vm496_vm3, 1.0, %v3050_v1  ;;  %vm494_vm3 = vcmp.eq.s32.totalorder %v3463_v50, %v4144_v48 }
 0x18e   : > { %v2692_v55 = vsel %vm1369_vm0, 1.0, %v3050_v1  ;;  %v2693_v39 = vsel %vm1370_vm1, 1.0, %v3050_v1  ;;  %1518 = vperm.xlu1 %2926, %v3867_v22  }
 0x18f   : > { %v1465_v45 = vadd.f32 %v2692_v55, %v4124_v2  ;;  %v1466_v61 = vadd.f32 %v2693_v39, %v4126_v28  ;;  %v2566_v2 = vsel %vm667_vm4, 1.0, %v3050_v1  ;;  %v2567_v28 = vsel %vm668_vm5, 1.0, %v3050_v1 }
 0x190   : > { %v763_v38 = vadd.f32 %v2566_v2, %v587_v19  ;;  %v5061_v19 = vld [vmem:[#allocation6_spill] sm:$0xff] }
 0x191   : > { %v4211_v25 = vpop.permute.xlu1 %283  ;;  %v1642_v53 = vadd.f32 %v2725_v31, %v1466_v61  ;;  %v1641_v22 = vadd.f32 %v2724_v26, %v1465_v45 }
 0x192   : > { %2928 = vset.pattern.permute.xlu1 %v5048_v16  ;;  %v764_v16 = vadd.f32 %v2567_v28, %v588_v7  ;;  %v939_v62 = vadd.f32 %v2598_v18, %v763_v38  ;;  %vm319_vm4 = vcmp.eq.s32.totalorder %v3455_v47, %v4211_v25  ;;  %vm320_vm5 = vcmp.eq.s32.totalorder %v3463_v50, %v4211_v25 }
 0x193   : > { %996 = vperm.xlu1 %2928, %v4086_v59   ;;  %1793 = vmatprep.mubr.f32.mxu0 %v1642_v53  ;;  %v2506_v26 = vsel %vm319_vm4, 1.0, %v3050_v1  ;;  %v2507_v31 = vsel %vm320_vm5, 1.0, %v3050_v1  ;;  %v2603_v25 = vsel %vm848_vm9, 1.0, %v3050_v1  ;;  %vm669_vm4 = vcmp.eq.s32.totalorder %v3455_v47, %v4179_v12 }
 0x194   : > { %1794 = vmatmul.mubr.f32.gmra.mxu0 %v1641_v22  ;;  %v940_v56 = vadd.f32 %v2599_v4, %v764_v16  ;;  %v1115_v35 = vadd.f32 %v2630_v17, %v939_v62  ;;  %v591_v29 = vadd.f32 %v2538_v23, %v2506_v26  ;;  %v592_v13 = vadd.f32 %v2539_v27, %v2507_v31 }
 0x195   : > { %vm670_vm5 = vcmp.eq.s32.totalorder %v3463_v50, %v4179_v12 }
 0x196   : > { %v4227_v40 = vpop.permute.xlu1 %808  ;;  %v1116_v0 = vadd.f32 %v2631_v11, %v940_v56 }
 0x197   : > { %2929 = vset.pattern.permute.xlu1 %v5050_v8 }
 0x198   : > { %1345 = vperm.xlu1 %2929, %v3970_v57  }
 0x19b   : > { %v1158_v15 = vpop.permute.xlu1 %1157 }
 0x19c   : > { %vm1195_vm12 = vcmp.eq.s32.totalorder %v3455_v47, %v1158_v15  ;;  %vm1196_vm13 = vcmp.eq.s32.totalorder %v3463_v50, %v1158_v15  ;;  %2930 = vset.pattern.permute.xlu1 %v5056_v37 }
 0x19d   : > { %v2662_v58 = vsel %vm1195_vm12, 1.0, %v3050_v1  ;;  %v2663_v52 = vsel %vm1196_vm13, 1.0, %v3050_v1  ;;  %1172 = vperm.xlu1 %2930, %v4086_v59   ;;  %vm1199_vm12 = vcmp.eq.s32.totalorder %v3455_v47, %v5061_v19  ;;  %vm1200_vm13 = vcmp.eq.s32.totalorder %v3463_v50, %v5061_v19 }
 0x19e   : > { %v1291_v6 = vadd.f32 %v2662_v58, %v1115_v35  ;;  %v1292_v36 = vadd.f32 %v2663_v52, %v1116_v0  ;;  %v2666_v62 = vsel %vm1199_vm12, 1.0, %v3050_v1  ;;  %v2667_v56 = vsel %vm1200_vm13, 1.0, %v3050_v1 }
 0x19f   : > { %v2569_v52 = vsel %vm670_vm5, 1.0, %v3050_v1 }
 0x1a0   : > { %v636_v10 = vpop.permute.xlu1 %635  ;;  %v1467_v49 = vadd.f32 %v2694_v60, %v1291_v6  ;;  %v1468_v21 = vadd.f32 %v2695_v14, %v1292_v36  ;;  %v2505_v60 = vsel %vm318_vm2, 1.0, %v3050_v1  ;;  %v2537_v14 = vsel %vm494_vm3, 1.0, %v3050_v1 }
 0x1a1   : > { %2931 = vset.pattern.permute.xlu1 %v5053_v46  ;;  %vm671_vm6 = vcmp.eq.s32.totalorder %v3455_v47, %v636_v10  ;;  %vm672_vm7 = vcmp.eq.s32.totalorder %v3463_v50, %v636_v10  ;;  %v590_v12 = vadd.f32 %v2537_v14, %v2505_v60 }
 0x1a2   : > { %1521 = vperm.xlu1 %2931, %v3970_v57   ;;  %v2570_v55 = vsel %vm671_vm6, 1.0, %v3050_v1  ;;  %v2571_v39 = vsel %vm672_vm7, 1.0, %v3050_v1  ;;  %vm845_vm6 = vcmp.eq.s32.totalorder %v3455_v47, %v4227_v40  ;;  %vm846_vm7 = vcmp.eq.s32.totalorder %v3463_v50, %v4227_v40 }
 0x1a3   : > { %v767_v45 = vadd.f32 %v2570_v55, %v591_v29  ;;  %v768_v61 = vadd.f32 %v2571_v39, %v592_v13  ;;  %v2600_v6 = vsel %vm845_vm6, 1.0, %v3050_v1  ;;  %v2601_v40 = vsel %vm846_vm7, 1.0, %v3050_v1 }
 0x1a4   : > { %vm1551_vm6 = vcmp.eq.s32.totalorder %v3455_v47, %v3665_v5  ;;  %vm1552_vm7 = vcmp.eq.s32.totalorder %v3463_v50, %v3665_v5 }
 0x1a5   : > { %v4247_v24 = vpop.permute.xlu1 %984  ;;  %v943_v2 = vadd.f32 %v2602_v51, %v767_v45  ;;  %v944_v28 = vadd.f32 %v2603_v25, %v768_v61 }
 0x1a6   : > { %2933 = vset.pattern.permute.xlu1 %v5050_v8  ;;  %vm1021_vm9 = vcmp.eq.s32.totalorder %v3455_v47, %v4247_v24 }
 0x1a7   : > { %1348 = vperm.xlu1 %2933, %v4086_v59  }
 0x1aa   : > { %v287_v30 = vpop.permute.xlu1 %286 }
 0x1ab   : > { %2934 = vset.pattern.permute.xlu1 %v5056_v37  ;;  %vm321_vm14 = vcmp.eq.s32.totalorder %v3455_v47, %v287_v30  ;;  %vm322_vm15 = vcmp.eq.s32.totalorder %v3463_v50, %v287_v30  ;;  %v2632_v30 = vsel %vm1021_vm9, 1.0, %v3050_v1 }
 0x1ac   : > { %1175 = vperm.xlu1 %2934, %v4168_v20   ;;  %v2508_v57 = vsel %vm321_vm14, 1.0, %v3050_v1  ;;  %v2509_v59 = vsel %vm322_vm15, 1.0, %v3050_v1 }
 0x1af   : > { %v463_v63 = vpop.permute.xlu1 %462 }
 0x1b0   : > { %vm497_vm0 = vcmp.eq.s32.totalorder %v3455_v47, %v463_v63  ;;  %vm498_vm1 = vcmp.eq.s32.totalorder %v3463_v50, %v463_v63  ;;  %2936 = vset.pattern.permute.xlu1 %v5050_v8  ;;  %v5063_v63 = vld [vmem:[#allocation8_spill] sm:$0xff] }
 0x1b1   : > { %v2540_v37 = vsel %vm497_vm0, 1.0, %v3050_v1  ;;  %v2541_v3 = vsel %vm498_vm1, 1.0, %v3050_v1  ;;  %1351 = vperm.xlu1 %2936, %v4168_v20   ;;  %vm317_vm0 = vcmp.eq.s32.totalorder %v3455_v47, %v5062_v33  ;;  %vm493_vm1 = vcmp.eq.s32.totalorder %v3455_v47, %v4144_v48 }
 0x1b2   : > { %v4267_v9 = vadd.f32 %v2540_v37, %v2508_v57  ;;  %v4269_v43 = vadd.f32 %v2541_v3, %v2509_v59  ;;  %v2504_v35 = vsel %vm317_vm0, 1.0, %v3050_v1  ;;  %v2536_v0 = vsel %vm493_vm1, 1.0, %v3050_v1 }
 0x1b3   : > { %v2568_v48 = vsel %vm669_vm4, 1.0, %v3050_v1  ;;  %v589_v58 = vadd.f32 %v2536_v0, %v2504_v35  ;;  %vm1025_vm13 = vcmp.eq.s32.totalorder %v3455_v47, %v5063_v63 }
 0x1b4   : > { %v4279_v8 = vpop.permute.xlu1 %1160 }
 0x1b5   : > { %2937 = vset.pattern.permute.xlu1 %v5053_v46  ;;  %v765_v10 = vadd.f32 %v2568_v48, %v589_v58  ;;  %vm1197_vm12 = vcmp.eq.s32.totalorder %v3455_v47, %v4279_v8 }
 0x1b6   : > { %1527 = vperm.xlu1 %2937, %v4168_v20   ;;  %v2664_v3 = vsel %vm1197_vm12, 1.0, %v3050_v1 }
 0x1b9   : > { %v1510_v46 = vpop.permute.xlu1 %1509 }
 0x1ba   : > { %vm1547_vm10 = vcmp.eq.s32.totalorder %v3455_v47, %v1510_v46  ;;  %vm1548_vm11 = vcmp.eq.s32.totalorder %v3463_v50, %v1510_v46 }
 0x1bb   : > { %v2726_v32 = vsel %vm1547_vm10, 1.0, %v3050_v1  ;;  %v2727_v20 = vsel %vm1548_vm11, 1.0, %v3050_v1  ;;  %vm674_vm10 = vcmp.eq.s32.totalorder %v3463_v50, %v4251_v42  ;;  %vm1022_vm11 = vcmp.eq.s32.totalorder %v3463_v50, %v4247_v24 }
 0x1bc   : > { %v1643_v53 = vadd.f32 %v2726_v32, %v1467_v49  ;;  %v1644_v22 = vadd.f32 %v2727_v20, %v1468_v21  ;;  %v766_v49 = vadd.f32 %v2569_v52, %v590_v12  ;;  %v2572_v21 = vsel %vm673_vm8, 1.0, %v3050_v1 }
 0x1bd   : > { %v941_v42 = vadd.f32 %v2600_v6, %v765_v10  ;;  %v2573_v57 = vsel %vm674_vm10, 1.0, %v3050_v1  ;;  %v2633_v59 = vsel %vm1022_vm11, 1.0, %v3050_v1  ;;  %v769_v54 = vadd.f32 %v2572_v21, %v4267_v9 }
 0x1be   : > { %1798 = vmatprep.mubr.f32.mxu0 %v1644_v22  ;;  %v988_v7 = vpop.permute.xlu1 %987  ;;  %v942_v24 = vadd.f32 %v2601_v40, %v766_v49  ;;  %v2730_v12 = vsel %vm1551_vm6, 1.0, %v3050_v1  ;;  %v2731_v6 = vsel %vm1552_vm7, 1.0, %v3050_v1  ;;  %vm1377_vm10 = vcmp.eq.s32.totalorder %v3455_v47, %v3973_v34 }
 0x1bf   : > { %vm1023_vm14 = vcmp.eq.s32.totalorder %v3455_v47, %v988_v7  ;;  %vm1024_vm15 = vcmp.eq.s32.totalorder %v3463_v50, %v988_v7  ;;  %1799 = vmatmul.mubr.f32.gmra.mxu0 %v1643_v53  ;;  %v1117_v37 = vadd.f32 %v2632_v30, %v941_v42  ;;  %v4394_v7 = vld [vmem:[%s5010_s2] ss:$0 sm:$0xff]  ;;  %vm1378_vm11 = vcmp.eq.s32.totalorder %v3463_v50, %v3973_v34 }
 0x1c0   : > { %v2634_v18 = vsel %vm1023_vm14, 1.0, %v3050_v1  ;;  %v2635_v4 = vsel %vm1024_vm15, 1.0, %v3050_v1  ;;  %vm1198_vm14 = vcmp.eq.s32.totalorder %v3463_v50, %v4279_v8  ;;  %vm1026_vm15 = vcmp.eq.s32.totalorder %v3463_v50, %v5063_v63 }
 0x1c1   : > { %v1119_v38 = vadd.f32 %v2634_v18, %v943_v2  ;;  %v1120_v16 = vadd.f32 %v2635_v4, %v944_v28  ;;  %v2665_v27 = vsel %vm1198_vm14, 1.0, %v3050_v1  ;;  %v770_v8 = vadd.f32 %v2573_v57, %v4269_v43 }
 0x1c2   : > { %v1118_v26 = vadd.f32 %v2633_v59, %v942_v24  ;;  %v1293_v39 = vadd.f32 %v2664_v3, %v1117_v37  ;;  %v2636_v43 = vsel %vm1025_vm13, 1.0, %v3050_v1  ;;  %v2637_v45 = vsel %vm1026_vm15, 1.0, %v3050_v1 }
 0x1c3   : > { %v1337_v17 = vpop.permute.xlu1 %1336  ;;  %v4325_v11 = vadd.f32 %v2666_v62, %v1119_v38  ;;  %v4327_v15 = vadd.f32 %v2667_v56, %v1120_v16 }
 0x1c4   : > { %vm1373_vm0 = vcmp.eq.s32.totalorder %v3455_v47, %v1337_v17  ;;  %vm1374_vm1 = vcmp.eq.s32.totalorder %v3463_v50, %v1337_v17  ;;  %v1294_v61 = vadd.f32 %v2665_v27, %v1118_v26 }
 0x1c5   : > { %v2696_v31 = vsel %vm1373_vm0, 1.0, %v3050_v1  ;;  %v2697_v29 = vsel %vm1374_vm1, 1.0, %v3050_v1 }
 0x1c6   : > { %v1469_v32 = vadd.f32 %v2696_v31, %v1293_v39  ;;  %v1470_v22 = vadd.f32 %v2697_v29, %v1294_v61 }
 0x1c8   : > { %v4348_v36 = vpop.permute.xlu1 %465 }
 0x1c9   : > { %vm500_vm6 = vcmp.eq.s32.totalorder %v3463_v50, %v4348_v36 }
 0x1cd   : > { %v815_v23 = vpop.permute.xlu1 %814 }
 0x1ce   : > { %vm849_vm2 = vcmp.eq.s32.totalorder %v3455_v47, %v815_v23  ;;  %vm850_vm3 = vcmp.eq.s32.totalorder %v3463_v50, %v815_v23  ;;  %v2701_v23 = vsel %vm1378_vm11, 1.0, %v3050_v1 }
 0x1cf   : > { %v2604_v44 = vsel %vm849_vm2, 1.0, %v3050_v1  ;;  %v2605_v55 = vsel %vm850_vm3, 1.0, %v3050_v1 }
 0x1d0   : > { %v945_v9 = vadd.f32 %v2604_v44, %v769_v54  ;;  %v946_v13 = vadd.f32 %v2605_v55, %v770_v8  ;;  %v2776_v46 = vpop.f32.mrf.mxu0 }
 0x1d2   : > { %v2777_v20 = vpop.f32.mrf.mxu0  ;;  %v1513_v51 = vpop.permute.xlu1 %1512  ;;  %v4385_v25 = vadd.f32 %v2636_v43, %v945_v9  ;;  %v4387_v53 = vadd.f32 %v2637_v45, %v946_v13 }
 0x1d3   : > { %v2778_v19 = vadd.f32 %v2777_v20, %v2776_v46  ;;  %vm1549_vm4 = vcmp.eq.s32.totalorder %v3455_v47, %v1513_v51  ;;  %vm1550_vm5 = vcmp.eq.s32.totalorder %v3463_v50, %v1513_v51 }
 0x1d4   : > { %v2728_v2 = vsel %vm1549_vm4, 1.0, %v3050_v1  ;;  %v2729_v28 = vsel %vm1550_vm5, 1.0, %v3050_v1  ;;  %v2779_v18 = vpop.f32.mrf.mxu0  ;;  %vm499_vm5 = vcmp.eq.s32.totalorder %v3455_v47, %v4348_v36 }
 0x1d5   : > { %v1834_v4 = vmul.f32 0.125, %v2778_v19  ;;  %v1645_v33 = vadd.f32 %v2728_v2, %v1469_v32  ;;  %v1646_v38 = vadd.f32 %v2729_v28, %v1470_v22  ;;  %v5064_v22 = vld [vmem:[#allocation4_spill] sm:$0xff]  ;;  %v5065_v28 = vld [vmem:[#allocation10_spill] sm:$0xff] }
 0x1d6   : > { %v2780_v16 = vpop.f32.mrf.mxu0  ;;  %vm323_vm14 = vcmp.eq.s32.totalorder %v3455_v47, %v5064_v22  ;;  %vm324_vm15 = vcmp.eq.s32.totalorder %v3463_v50, %v5064_v22  ;;  %vm501_vm0 = vcmp.eq.s32.totalorder %v3455_v47, %v5065_v28  ;;  %vm502_vm3 = vcmp.eq.s32.totalorder %v3463_v50, %v5065_v28 }
 0x1d7   : > { %v1857_v62 = vadd.f32 %v4394_v7, %v1834_v4  ;;  %v2781_v56 = vadd.f32 %v2780_v16, %v2779_v18  ;;  %1803 = vmatprep.mubr.f32.mxu0 %v1646_v38  ;;  %v4399_v17 = vpop.permute.xlu1 %641 }
 0x1d8   : > { %v2782_v35 = vpop.f32.mrf.mxu0  ;;  %1804 = vmatmul.mubr.f32.gmra.mxu0 %v1645_v33 }
 0x1d9   : > { %v1835_v0 = vmul.f32 0.125, %v2781_v56  ;;  %1982 = vmatmul.mubr.f32.vlgmr.msra.gmra.mxu1 %v1857_v62  ;;  %v2510_v56 = vsel %vm323_vm14, 1.0, %v3050_v1 }
 0x1da   : > { %v2783_v60 = vpop.f32.mrf.mxu0  ;;  %1987 = vmatprep.mubr.f32.mxu1 %v3050_v1 }
 0x1db   : > { %v1858_v14 = vadd.f32 %v4394_v7, %v1835_v0  ;;  %v2784_v48 = vadd.f32 %v2783_v60, %v2782_v35  ;;  %v2511_v35 = vsel %vm324_vm15, 1.0, %v3050_v1  ;;  %v2544_v0 = vsel %vm501_vm0, 1.0, %v3050_v1 }
 0x1dc   : > { %v1340_v58 = vpop.permute.xlu1 %1339  ;;  %v2545_v60 = vsel %vm502_vm3, 1.0, %v3050_v1 }
 0x1dd   : > { %v1836_v52 = vmul.f32 0.125, %v2784_v48  ;;  %vm1375_vm8 = vcmp.eq.s32.totalorder %v3455_v47, %v1340_v58  ;;  %vm1376_vm9 = vcmp.eq.s32.totalorder %v3463_v50, %v1340_v58  ;;  %1988 = vmatmul.mubr.f32.gmra.mxu1 %v1858_v14  ;;  %v2542_v58 = vsel %vm499_vm5, 1.0, %v3050_v1 }
 0x1de   : > { %v2698_v10 = vsel %vm1375_vm8, 1.0, %v3050_v1  ;;  %v2699_v40 = vsel %vm1376_vm9, 1.0, %v3050_v1  ;;  %1993 = vmatprep.mubr.f32.mxu1 %v3050_v1  ;;  %vm679_vm9 = vcmp.eq.s32.totalorder %v3455_v47, %v4257_v41  ;;  %vm680_vm5 = vcmp.eq.s32.totalorder %v3463_v50, %v4257_v41 }
 0x1df   : > { %v1859_v5 = vadd.f32 %v4394_v7, %v1836_v52  ;;  %v1471_v49 = vadd.f32 %v2698_v10, %v4325_v11  ;;  %v1472_v21 = vadd.f32 %v2699_v40, %v4327_v15  ;;  %v2785_v30 = vpop.f32.mrf.mxu0  ;;  %v2700_v15 = vsel %vm1377_vm10, 1.0, %v3050_v1 }
 0x1e0   : > { %vm675_vm10 = vcmp.eq.s32.totalorder %v3455_v47, %v4399_v17  ;;  %v2543_v52 = vsel %vm500_vm6, 1.0, %v3050_v1 }
 0x1e1   : > { %v2786_v63 = vpop.f32.mrf.mxu0  ;;  %1994 = vmatmul.mubr.f32.gmra.mxu1 %v1859_v5  ;;  %v4417_v42 = vpop.permute.xlu1 %292  ;;  %v1648_v57 = vadd.f32 %v2731_v6, %v1472_v21  ;;  %v1647_v24 = vadd.f32 %v2730_v12, %v1471_v49  ;;  %v2574_v36 = vsel %vm675_vm10, 1.0, %v3050_v1  ;;  %v595_v5 = vadd.f32 %v2542_v58, %v2510_v56 }
 0x1e2   : > { %v2787_v59 = vadd.f32 %v2786_v63, %v2785_v30  ;;  %1999 = vmatprep.mubr.f32.mxu1 %v3050_v1  ;;  %vm325_vm4 = vcmp.eq.s32.totalorder %v3455_v47, %v4417_v42  ;;  %vm326_vm7 = vcmp.eq.s32.totalorder %v3463_v50, %v4417_v42  ;;  %v596_v49 = vadd.f32 %v2543_v52, %v2511_v35 }
 0x1e3   : > { %1808 = vmatprep.mubr.f32.mxu0 %v1648_v57  ;;  %v2512_v48 = vsel %vm325_vm4, 1.0, %v3050_v1  ;;  %v2513_v12 = vsel %vm326_vm7, 1.0, %v3050_v1 }
 0x1e4   : > { %v1837_v37 = vmul.f32 0.125, %v2787_v59  ;;  %1809 = vmatmul.mubr.f32.gmra.mxu0 %v1647_v24  ;;  %v597_v10 = vadd.f32 %v2544_v0, %v2512_v48  ;;  %v598_v30 = vadd.f32 %v2545_v60, %v2513_v12  ;;  %v771_v24 = vadd.f32 %v2574_v36, %v595_v5 }
 0x1e5   : > { %v2579_v48 = vsel %vm680_vm5, 1.0, %v3050_v1 }
 0x1e6   : > { %v1860_v3 = vadd.f32 %v4394_v7, %v1837_v37  ;;  %v4421_v54 = vpop.permute.xlu1 %817 }
 0x1e7   : > { %vm852_vm0 = vcmp.eq.s32.totalorder %v3463_v50, %v4421_v54 }
 0x1e8   : > { %2000 = vmatmul.mubr.f32.gmra.mxu1 %v1860_v3  ;;  %v2607_v59 = vsel %vm852_vm0, 1.0, %v3050_v1 }
 0x1e9   : > { %2005 = vmatprep.mubr.f32.mxu1 %v3050_v1 }
 0x1eb   : > { %v1167_v11 = vpop.permute.xlu1 %1166 }
 0x1ec   : > { %vm1201_vm12 = vcmp.eq.s32.totalorder %v3455_v47, %v1167_v11  ;;  %vm1202_vm13 = vcmp.eq.s32.totalorder %v3463_v50, %v1167_v11 }
 0x1ed   : > { %v2668_v27 = vsel %vm1201_vm12, 1.0, %v3050_v1  ;;  %v2669_v8 = vsel %vm1202_vm13, 1.0, %v3050_v1  ;;  %vm676_vm12 = vcmp.eq.s32.totalorder %v3463_v50, %v4399_v17  ;;  %vm851_vm13 = vcmp.eq.s32.totalorder %v3455_v47, %v4421_v54 }
 0x1ee   : > { %v1297_v26 = vadd.f32 %v2668_v27, %v4385_v25  ;;  %v1298_v31 = vadd.f32 %v2669_v8, %v4387_v53  ;;  %v821_v53 = vpop.permute.xlu0 %820  ;;  %v2575_v21 = vsel %vm676_vm12, 1.0, %v3050_v1  ;;  %v2606_v42 = vsel %vm851_vm13, 1.0, %v3050_v1 }
 0x1ef   : > { %vm853_vm14 = vcmp.eq.s32.totalorder %v3455_v47, %v821_v53  ;;  %vm854_vm15 = vcmp.eq.s32.totalorder %v3463_v50, %v821_v53  ;;  %v772_v54 = vadd.f32 %v2575_v21, %v596_v49  ;;  %v947_v27 = vadd.f32 %v2606_v42, %v771_v24 }
 0x1f0   : > { %v645_v44 = vpop.permute.xlu1 %644  ;;  %v1473_v55 = vadd.f32 %v2700_v15, %v1297_v26  ;;  %v1474_v34 = vadd.f32 %v2701_v23, %v1298_v31  ;;  %v2608_v3 = vsel %vm853_vm14, 1.0, %v3050_v1  ;;  %v2609_v11 = vsel %vm854_vm15, 1.0, %v3050_v1 }
 0x1f1   : > { %vm677_vm8 = vcmp.eq.s32.totalorder %v3455_v47, %v645_v44  ;;  %vm678_vm11 = vcmp.eq.s32.totalorder %v3463_v50, %v645_v44  ;;  %v4542_v23 = vsel %vm679_vm9, 1.0, %v3050_v1  ;;  %v948_v31 = vadd.f32 %v2607_v59, %v772_v54 }
 0x1f2   : > { %v4461_v38 = vpop.permute.xlu0 %823  ;;  %v2576_v6 = vsel %vm677_vm8, 1.0, %v3050_v1  ;;  %v2577_v17 = vsel %vm678_vm11, 1.0, %v3050_v1 }
 0x1f3   : > { %v773_v57 = vadd.f32 %v2576_v6, %v597_v10  ;;  %v774_v37 = vadd.f32 %v2577_v17, %v598_v30 }
 0x1f5   : > { %v4436_v39 = vpop.permute.xlu1 %993  ;;  %v949_v44 = vadd.f32 %v2608_v3, %v773_v57 }
 0x1f6   : > { %v4515_v40 = vpop.permute.xlu0 %999 }
 0x1f7   : > { %vm1031_vm5 = vcmp.eq.s32.totalorder %v3455_v47, %v4515_v40 }
 0x1f8   : > { %v2788_v29 = vpop.f32.mrf.mxu0  ;;  %v2642_v3 = vsel %vm1031_vm5, 1.0, %v3050_v1 }
 0x1fa   : > { %v2789_v9 = vpop.f32.mrf.mxu0  ;;  %v4438_v13 = vpop.permute.xlu1 %295 }
 0x1fb   : > { %v2790_v46 = vadd.f32 %v2789_v9, %v2788_v29  ;;  %v4534_v15 = vpop.permute.xlu0 %1524  ;;  %vm327_vm13 = vcmp.eq.s32.totalorder %v3455_v47, %v4438_v13  ;;  %vm328_vm14 = vcmp.eq.s32.totalorder %v3463_v50, %v4438_v13 }
 0x1fc   : > { %vm1557_vm9 = vcmp.eq.s32.totalorder %v3455_v47, %v4534_v15  ;;  %vm1558_vm10 = vcmp.eq.s32.totalorder %v3463_v50, %v4534_v15  ;;  %v2515_v35 = vsel %vm328_vm14, 1.0, %v3050_v1 }
 0x1fd   : > { %v1838_v43 = vmul.f32 0.125, %v2790_v46  ;;  %v2736_v36 = vsel %vm1557_vm9, 1.0, %v3050_v1  ;;  %v2737_v10 = vsel %vm1558_vm10, 1.0, %v3050_v1  ;;  %vm1032_vm9 = vcmp.eq.s32.totalorder %v3463_v50, %v4515_v40 }
 0x1ff   : > { %v1861_v45 = vadd.f32 %v4394_v7, %v1838_v43  ;;  %v4441_v61 = vpop.permute.xlu1 %471 }
 0x200   : > { %vm503_vm8 = vcmp.eq.s32.totalorder %v3455_v47, %v4441_v61  ;;  %vm504_vm15 = vcmp.eq.s32.totalorder %v3463_v50, %v4441_v61  ;;  %v2514_v61 = vsel %vm327_vm13, 1.0, %v3050_v1 }
 0x201   : > { %2006 = vmatmul.mubr.f32.gmra.mxu1 %v1861_v45  ;;  %v2547_v28 = vsel %vm504_vm15, 1.0, %v3050_v1 }
 0x202   : > { %2011 = vmatprep.mubr.f32.mxu1 %v3050_v1  ;;  %v600_v58 = vadd.f32 %v2547_v28, %v2515_v35 }
 0x204   : > { %v2791_v32 = vpop.f32.mrf.mxu0  ;;  %v4444_v20 = vpop.permute.xlu1 %1169  ;;  %v776_v21 = vadd.f32 %v2579_v48, %v600_v58  ;;  %v1905_v58 = vld [vmem:[%s5012_s4] sm:$0x3] }
 0x205   : > { %vm1203_vm3 = vcmp.eq.s32.totalorder %v3455_v47, %v4444_v20  ;;  %vm1204_vm4 = vcmp.eq.s32.totalorder %v3463_v50, %v4444_v20 }
 0x206   : > { %v2792_v51 = vpop.f32.mrf.mxu0  ;;  %v2671_v29 = vsel %vm1204_vm4, 1.0, %v3050_v1  ;;  %vm855_vm4 = vcmp.eq.s32.totalorder %v3455_v47, %v4461_v38 }
 0x207   : > { %v2793_v25 = vadd.f32 %v2792_v51, %v2791_v32  ;;  %v2546_v32 = vsel %vm503_vm8, 1.0, %v3050_v1  ;;  %v2610_v30 = vsel %vm855_vm4, 1.0, %v3050_v1 }
 0x208   : > { %v599_v0 = vadd.f32 %v2546_v32, %v2514_v61 }
 0x209   : > { %v1839_v19 = vmul.f32 0.125, %v2793_v25  ;;  %v1519_v2 = vpop.permute.xlu1 %1518 }
 0x20a   : > { %vm1553_vm1 = vcmp.eq.s32.totalorder %v3455_v47, %v1519_v2  ;;  %vm1554_vm2 = vcmp.eq.s32.totalorder %v3463_v50, %v1519_v2  ;;  %v775_v17 = vadd.f32 %v4542_v23, %v599_v0  ;;  %v5066_v0 = vlaneseq }
 0x20b   : > { %v1862_v18 = vadd.f32 %v4394_v7, %v1839_v19  ;;  %v2732_v4 = vsel %vm1553_vm1, 1.0, %v3050_v1  ;;  %v2733_v33 = vsel %vm1554_vm2, 1.0, %v3050_v1  ;;  %vm1027_vm1 = vcmp.eq.s32.totalorder %v3455_v47, %v4436_v39 }
 0x20c   : > { %v1649_v16 = vadd.f32 %v2732_v4, %v1473_v55  ;;  %v1650_v62 = vadd.f32 %v2733_v33, %v1474_v34  ;;  %vm1028_vm2 = vcmp.eq.s32.totalorder %v3463_v50, %v4436_v39  ;;  %v2638_v8 = vsel %vm1027_vm1, 1.0, %v3050_v1 }
 0x20d   : > { %2012 = vmatmul.mubr.f32.gmra.mxu1 %v1862_v18  ;;  %v2639_v26 = vsel %vm1028_vm2, 1.0, %v3050_v1  ;;  %v950_v34 = vadd.f32 %v2609_v11, %v774_v37  ;;  %v2670_v39 = vsel %vm1203_vm3, 1.0, %v3050_v1  ;;  %v1123_v9 = vadd.f32 %v2638_v8, %v947_v27 }
 0x20e   : > { %1813 = vmatprep.mubr.f32.mxu0 %v1650_v62  ;;  %v4480_v14 = vpop.permute.xlu1 %996  ;;  %2017 = vmatprep.mubr.f32.mxu1 %v3050_v1  ;;  %v1124_v46 = vadd.f32 %v2639_v26, %v948_v31  ;;  %v951_v59 = vadd.f32 %v2610_v30, %v775_v17 }
 0x20f   : > { %1814 = vmatmul.mubr.f32.gmra.mxu0 %v1649_v16  ;;  %vm1029_vm11 = vcmp.eq.s32.totalorder %v3455_v47, %v4480_v14  ;;  %vm1030_vm12 = vcmp.eq.s32.totalorder %v3463_v50, %v4480_v14  ;;  %v1299_v20 = vadd.f32 %v2670_v39, %v1123_v9 }
 0x210   : > { %v1300_v51 = vadd.f32 %v2671_v29, %v1124_v46  ;;  %v2640_v25 = vsel %vm1029_vm11, 1.0, %v3050_v1  ;;  %v2641_v53 = vsel %vm1030_vm12, 1.0, %v3050_v1  ;;  %v1127_v15 = vadd.f32 %v2642_v3, %v951_v59 }
 0x211   : > { %v1125_v60 = vadd.f32 %v2640_v25, %v949_v44  ;;  %v1126_v14 = vadd.f32 %v2641_v53, %v950_v34 }
 0x213   : > { %v1346_v63 = vpop.permute.xlu1 %1345 }
 0x214   : > { %vm1379_vm6 = vcmp.eq.s32.totalorder %v3455_v47, %v1346_v63  ;;  %vm1380_vm7 = vcmp.eq.s32.totalorder %v3463_v50, %v1346_v63 }
 0x215   : > { %v2702_v43 = vsel %vm1379_vm6, 1.0, %v3050_v1  ;;  %v2703_v45 = vsel %vm1380_vm7, 1.0, %v3050_v1  ;;  %vm856_vm6 = vcmp.eq.s32.totalorder %v3463_v50, %v4461_v38  ;;  %v2643_v38 = vsel %vm1032_vm9, 1.0, %v3050_v1 }
 0x216   : > { %v1475_v19 = vadd.f32 %v2702_v43, %v1299_v20  ;;  %v1476_v2 = vadd.f32 %v2703_v45, %v1300_v51  ;;  %v2611_v63 = vsel %vm856_vm6, 1.0, %v3050_v1 }
 0x217   : > { %v952_v37 = vadd.f32 %v2611_v63, %v776_v21 }
 0x218   : > { %v1173_v55 = vpop.permute.xlu1 %1172 }
 0x219   : > { %vm1205_vm0 = vcmp.eq.s32.totalorder %v3455_v47, %v1173_v55  ;;  %vm1206_vm1 = vcmp.eq.s32.totalorder %v3463_v50, %v1173_v55  ;;  %v1128_v40 = vadd.f32 %v2643_v38, %v952_v37 }
 0x21a   : > { %v2672_v33 = vsel %vm1205_vm0, 1.0, %v3050_v1  ;;  %v2673_v16 = vsel %vm1206_vm1, 1.0, %v3050_v1  ;;  %vm2079_vm0 = vcmp.lt.s32.totalorder %v3463_v50, 140 }
 0x21b   : > { %v1301_v12 = vadd.f32 %v2672_v33, %v1125_v60  ;;  %v1302_v13 = vadd.f32 %v2673_v16, %v1126_v14  ;;  %v1908_v60 = vshrl.u32 %v5066_v0, 7 }
 0x21d   : > { %v1522_v22 = vpop.permute.xlu1 %1521  ;;  %v1913_v14 = vsub.s32 1, %v1908_v60  ;;  %v1909_v48 = vsub.s32 0, %v1908_v60 }
 0x21e   : > { %vm1555_vm2 = vcmp.eq.s32.totalorder %v3455_v47, %v1522_v22  ;;  %vm1556_vm3 = vcmp.eq.s32.totalorder %v3463_v50, %v1522_v22 }
 0x21f   : > { %v2734_v18 = vsel %vm1555_vm2, 1.0, %v3050_v1  ;;  %v2735_v4 = vsel %vm1556_vm3, 1.0, %v3050_v1 }
 0x220   : > { %v1651_v62 = vadd.f32 %v2734_v18, %v1475_v19  ;;  %v1652_v56 = vadd.f32 %v2735_v4, %v1476_v2 }
 0x222   : > { %1818 = vmatprep.mubr.f32.mxu0 %v1652_v56  ;;  %v1349_v52 = vpop.permute.xlu1 %1348 }
 0x223   : > { %vm1381_vm7 = vcmp.eq.s32.totalorder %v3455_v47, %v1349_v52  ;;  %vm1382_vm8 = vcmp.eq.s32.totalorder %v3463_v50, %v1349_v52  ;;  %1819 = vmatmul.mubr.f32.gmra.mxu0 %v1651_v62 }
 0x224   : > { %v2704_v6 = vsel %vm1381_vm7, 1.0, %v3050_v1  ;;  %v2705_v41 = vsel %vm1382_vm8, 1.0, %v3050_v1 }
 0x225   : > { %v1477_v5 = vadd.f32 %v2704_v6, %v1301_v12  ;;  %v1478_v49 = vadd.f32 %v2705_v41, %v1302_v13  ;;  %v4647_v12 = vrot.slane %v1905_v58, %v1913_v14  ;;  %v4649_v13 = vrot.slane %v1905_v58, %v1909_v48 }
 0x227   : > { %v1653_v42 = vadd.f32 %v2736_v36, %v1477_v5  ;;  %v1654_v57 = vadd.f32 %v2737_v10, %v1478_v49  ;;  %v1176_v24 = vpop.permute.xlu1 %1175 }
 0x228   : > { %vm1207_vm10 = vcmp.eq.s32.totalorder %v3455_v47, %v1176_v24  ;;  %vm1208_vm11 = vcmp.eq.s32.totalorder %v3463_v50, %v1176_v24 }
 0x229   : > { %1823 = vmatprep.mubr.f32.mxu0 %v1654_v57  ;;  %v2674_v54 = vsel %vm1207_vm10, 1.0, %v3050_v1  ;;  %v2675_v23 = vsel %vm1208_vm11, 1.0, %v3050_v1 }
 0x22a   : > { %1824 = vmatmul.mubr.f32.gmra.mxu0 %v1653_v42  ;;  %v1303_v8 = vadd.f32 %v2674_v54, %v1127_v15  ;;  %v1304_v44 = vadd.f32 %v2675_v23, %v1128_v40 }
 0x22c   : > { %v1352_v11 = vpop.permute.xlu1 %1351 }
 0x22d   : > { %vm1383_vm12 = vcmp.eq.s32.totalorder %v3455_v47, %v1352_v11  ;;  %vm1384_vm13 = vcmp.eq.s32.totalorder %v3463_v50, %v1352_v11 }
 0x22e   : > { %v2706_v27 = vsel %vm1383_vm12, 1.0, %v3050_v1  ;;  %v2707_v26 = vsel %vm1384_vm13, 1.0, %v3050_v1 }
 0x22f   : > { %v2794_v31 = vpop.f32.mrf.mxu0  ;;  %v1479_v55 = vadd.f32 %v2706_v27, %v1303_v8  ;;  %v1480_v29 = vadd.f32 %v2707_v26, %v1304_v44 }
 0x231   : > { %v2795_v34 = vpop.f32.mrf.mxu0  ;;  %v1528_v39 = vpop.permute.xlu1 %1527 }
 0x232   : > { %v2796_v9 = vadd.f32 %v2795_v34, %v2794_v31  ;;  %vm1559_vm14 = vcmp.eq.s32.totalorder %v3455_v47, %v1528_v39  ;;  %vm1560_vm15 = vcmp.eq.s32.totalorder %v3463_v50, %v1528_v39 }
 0x233   : > { %v2738_v46 = vsel %vm1559_vm14, 1.0, %v3050_v1  ;;  %v2739_v43 = vsel %vm1560_vm15, 1.0, %v3050_v1 }
 0x234   : > { %v1840_v45 = vmul.f32 0.125, %v2796_v9  ;;  %v1655_v32 = vadd.f32 %v2738_v46, %v1479_v55  ;;  %v1656_v20 = vadd.f32 %v2739_v43, %v1480_v29 }
 0x236   : > { %v1863_v51 = vadd.f32 %v4394_v7, %v1840_v45  ;;  %1828 = vmatprep.mubr.f32.mxu0 %v1656_v20 }
 0x237   : > { %1829 = vmatmul.mubr.f32.gmra.mxu0 %v1655_v32 }
 0x238   : > { %2018 = vmatmul.mubr.f32.gmra.mxu1 %v1863_v51 }
 0x239   : > { %2023 = vmatprep.mubr.f32.mxu1 %v3050_v1 }
 0x248   : > { %v2797_v25 = vpop.f32.mrf.mxu0 }
 0x24a   : > { %v2798_v53 = vpop.f32.mrf.mxu0 }
 0x24b   : > { %v2799_v22 = vadd.f32 %v2798_v53, %v2797_v25 }
 0x24d   : > { %v1841_v47 = vmul.f32 0.125, %v2799_v22 }
 0x24f   : > { %v1864_v19 = vadd.f32 %v4394_v7, %v1841_v47 }
 0x251   : > { %2024 = vmatmul.mubr.f32.gmra.mxu1 %v1864_v19 }
 0x252   : > { %2029 = vmatprep.mubr.f32.mxu1 %v3050_v1 }
 0x254   : > { %v2800_v2 = vpop.f32.mrf.mxu0 }
 0x256   : > { %v2801_v61 = vpop.f32.mrf.mxu0 }
 0x257   : > { %v2802_v28 = vadd.f32 %v2801_v61, %v2800_v2 }
 0x259   : > { %v1842_v18 = vmul.f32 0.125, %v2802_v28 }
 0x25b   : > { %v1865_v4 = vadd.f32 %v4394_v7, %v1842_v18 }
 0x25d   : > { %2030 = vmatmul.mubr.f32.gmra.mxu1 %v1865_v4 }
 0x25e   : > { %2035 = vmatprep.mubr.f32.mxu1 %v3050_v1 }
 0x27f   : > { %v2803_v33 = vpop.f32.mrf.mxu0 }
 0x281   : > { %v2804_v16 = vpop.f32.mrf.mxu0 }
 0x282   : > { %v2805_v62 = vadd.f32 %v2804_v16, %v2803_v33 }
 0x284   : > { %v1843_v56 = vmul.f32 0.125, %v2805_v62 }
 0x286   : > { %v1866_v35 = vadd.f32 %v4394_v7, %v1843_v56 }
 0x288   : > { %2036 = vmatmul.mubr.f32.gmra.mxu1 %v1866_v35 }
 0x289   : > { %2041 = vmatprep.mubr.f32.mxu1 %v3050_v1 }
 0x298   : > { %v2806_v52 = vpop.f32.mrf.mxu0 }
 0x299   : > { %v1983_v6 = vpop.f32.mrf.mxu1 }
 0x29a   : > { %v2807_v41 = vpop.f32.mrf.mxu0  ;;  %v4654_v5 = vadd.f32 %v1983_v6, %v4649_v13 }
 0x29b   : > { %v2808_v36 = vadd.f32 %v2807_v41, %v2806_v52  ;;  %v1985_v10 = vpop.f32.mrf.mxu1 }
 0x29c   : > { %v1986_v17 = vadd.f32 %v1985_v10, %v4647_v12 }
 0x29d   : > { %v1844_v49 = vmul.f32 0.125, %v2808_v36  ;;  %v1989_v21 = vpop.f32.mrf.mxu1 }
 0x29e   : > { %v4658_v30 = vsel %vm2079_vm0, %v1986_v17, -1e+30  ;;  %v4665_v59 = vadd.f32 %v1989_v21, %v4649_v13 }
 0x29f   : > { %v1867_v63 = vadd.f32 %v4394_v7, %v1844_v49  ;;  %v1991_v42 = vpop.f32.mrf.mxu1  ;;  %v2112_v57 = vmax.f32 %v4654_v5, %v4658_v30 }
 0x2a0   : > { %v1992_v24 = vadd.f32 %v1991_v42, %v4647_v12 }
 0x2a1   : > { %2113 = vmax.xlane.f32.xlu0 %v2112_v57  ;;  %v1995_v37 = vpop.f32.mrf.mxu1  ;;  %2042 = vmatmul.mubr.f32.gmra.mxu1 %v1867_v63 }
 0x2a2   : > { %v4669_v3 = vsel %vm2079_vm0, %v1992_v24, -1e+30  ;;  %2047 = vmatprep.mubr.f32.mxu1 %v3050_v1  ;;  %v4676_v23 = vadd.f32 %v1995_v37, %v4649_v13 }
 0x2a3   : > { %v1997_v38 = vpop.f32.mrf.mxu1  ;;  %v2115_v54 = vmax.f32 %v4665_v59, %v4669_v3 }
 0x2a4   : > { %v1998_v11 = vadd.f32 %v1997_v38, %v4647_v12  ;;  %v2809_v15 = vpop.f32.mrf.mxu0 }
 0x2a5   : > { %2116 = vmax.xlane.f32.xlu1 %v2115_v54 }
 0x2a6   : > { %v4680_v40 = vsel %vm2079_vm0, %v1998_v11, -1e+30  ;;  %v2810_v27 = vpop.f32.mrf.mxu0 }
 0x2a7   : > { %v2811_v8 = vadd.f32 %v2810_v27, %v2809_v15  ;;  %v2118_v26 = vmax.f32 %v4676_v23, %v4680_v40 }
 0x2a8   : > { %v2001_v31 = vpop.f32.mrf.mxu1 }
 0x2a9   : > { %v1845_v44 = vmul.f32 0.125, %v2811_v8  ;;  %2119 = vmax.xlane.f32.xlu0 %v2118_v26  ;;  %v4687_v29 = vadd.f32 %v2001_v31, %v4649_v13 }
 0x2aa   : > { %v2003_v55 = vpop.f32.mrf.mxu1 }
 0x2ab   : > { %v1868_v34 = vadd.f32 %v4394_v7, %v1845_v44  ;;  %v2004_v39 = vadd.f32 %v2003_v55, %v4647_v12 }
 0x2ad   : > { %v4691_v9 = vsel %vm2079_vm0, %v2004_v39, -1e+30  ;;  %2048 = vmatmul.mubr.f32.gmra.mxu1 %v1868_v34 }
 0x2ae   : > { %v2121_v46 = vmax.f32 %v4687_v29, %v4691_v9  ;;  %2053 = vmatprep.mubr.f32.mxu1 %v3050_v1 }
 0x2b0   : > { %2122 = vmax.xlane.f32.xlu0 %v2121_v46 }
 0x2c1   : > { %v2007_v43 = vpop.f32.mrf.mxu1 }
 0x2c2   : > { %v4698_v20 = vadd.f32 %v2007_v43, %v4649_v13 }
 0x2c3   : > { %v2009_v45 = vpop.f32.mrf.mxu1 }
 0x2c4   : > { %v2010_v32 = vadd.f32 %v2009_v45, %v4647_v12 }
 0x2c6   : > { %v4702_v51 = vsel %vm2079_vm0, %v2010_v32, -1e+30 }
 0x2c7   : > { %v2124_v25 = vmax.f32 %v4698_v20, %v4702_v51 }
 0x2c9   : > { %2125 = vmax.xlane.f32.xlu1 %v2124_v25 }
 0x2cd   : > { %v2013_v53 = vpop.f32.mrf.mxu1 }
 0x2ce   : > { %v4708_v2 = vadd.f32 %v2013_v53, %v4649_v13 }
 0x2cf   : > { %v2812_v22 = vpop.f32.mrf.mxu0  ;;  %v2015_v47 = vpop.f32.mrf.mxu1 }
 0x2d0   : > { %v2016_v19 = vadd.f32 %v2015_v47, %v4647_v12 }
 0x2d1   : > { %v2813_v61 = vpop.f32.mrf.mxu0 }
 0x2d2   : > { %v4712_v28 = vsel %vm2079_vm0, %v2016_v19, -1e+30  ;;  %v2814_v18 = vadd.f32 %v2813_v61, %v2812_v22 }
 0x2d3   : > { %v2127_v4 = vmax.f32 %v4708_v2, %v4712_v28 }
 0x2d4   : > { %v1846_v33 = vmul.f32 0.125, %v2814_v18 }
 0x2d5   : > { %2128 = vmax.xlane.f32.xlu0 %v2127_v4 }
 0x2d6   : > { %v1869_v16 = vadd.f32 %v4394_v7, %v1846_v33 }
 0x2d8   : > { %2054 = vmatmul.mubr.f32.gmra.mxu1 %v1869_v16 }
 0x2d9   : > { %2059 = vmatprep.mubr.f32.mxu1 %v3050_v1 }
 0x2e3   : > { %v2815_v62 = vpop.f32.mrf.mxu0 }
 0x2e5   : > { %v2816_v56 = vpop.f32.mrf.mxu0 }
 0x2e6   : > { %v2817_v35 = vadd.f32 %v2816_v56, %v2815_v62 }
 0x2e8   : > { %v1847_v0 = vmul.f32 0.125, %v2817_v35 }
 0x2ea   : > { %v1870_v60 = vadd.f32 %v4394_v7, %v1847_v0  ;;  %v2818_v14 = vpop.f32.mrf.mxu0 }
 0x2ec   : > { %v2819_v48 = vpop.f32.mrf.mxu0  ;;  %2060 = vmatmul.mubr.f32.gmra.mxu1 %v1870_v60 }
 0x2ed   : > { %v2820_v58 = vadd.f32 %v2819_v48, %v2818_v14  ;;  %2065 = vmatprep.mubr.f32.mxu1 %v3050_v1 }
 0x2ef   : > { %v1848_v52 = vmul.f32 0.125, %v2820_v58 }
 0x2f1   : > { %v1871_v6 = vadd.f32 %v4394_v7, %v1848_v52 }
 0x2f3   : > { %2066 = vmatmul.mubr.f32.gmra.mxu1 %v1871_v6 }
 0x2f4   : > { %2071 = vmatprep.mubr.f32.mxu1 %v3050_v1 }
 0x2f7   : > { %v2821_v41 = vpop.f32.mrf.mxu0 }
 0x2f8   : > { %v2019_v36 = vpop.f32.mrf.mxu1 }
 0x2f9   : > { %v2822_v10 = vpop.f32.mrf.mxu0  ;;  %v4724_v63 = vadd.f32 %v2019_v36, %v4649_v13 }
 0x2fa   : > { %v2823_v17 = vadd.f32 %v2822_v10, %v2821_v41  ;;  %v2021_v49 = vpop.f32.mrf.mxu1 }
 0x2fb   : > { %v2022_v21 = vadd.f32 %v2021_v49, %v4647_v12 }
 0x2fc   : > { %v1849_v42 = vmul.f32 0.125, %v2823_v17 }
 0x2fd   : > { %v4728_v57 = vsel %vm2079_vm0, %v2022_v21, -1e+30 }
 0x2fe   : > { %v1872_v24 = vadd.f32 %v4394_v7, %v1849_v42  ;;  %v2130_v1 = vmax.f32 %v4724_v63, %v4728_v57 }
 0x300   : > { %2131 = vmax.xlane.f32.xlu1 %v2130_v1  ;;  %2072 = vmatmul.mubr.f32.gmra.mxu1 %v1872_v24 }
 0x311   : > { %v2025_v37 = vpop.f32.mrf.mxu1 }
 0x312   : > { %v4735_v11 = vadd.f32 %v2025_v37, %v4649_v13 }
 0x313   : > { %v2027_v38 = vpop.f32.mrf.mxu1 }
 0x314   : > { %v2028_v54 = vadd.f32 %v2027_v38, %v4647_v12 }
 0x316   : > { %v4739_v15 = vsel %vm2079_vm0, %v2028_v54, -1e+30 }
 0x317   : > { %v2133_v27 = vmax.f32 %v4735_v11, %v4739_v15 }
 0x319   : > { %2134 = vmax.xlane.f32.xlu0 %v2133_v27 }
 0x31d   : > { %v2031_v7 = vpop.f32.mrf.mxu1 }
 0x31e   : > { %v4745_v31 = vadd.f32 %v2031_v7, %v4649_v13 }
 0x31f   : > { %v2033_v8 = vpop.f32.mrf.mxu1 }
 0x320   : > { %v2034_v26 = vadd.f32 %v2033_v8, %v4647_v12 }
 0x322   : > { %v4749_v44 = vsel %vm2079_vm0, %v2034_v26, -1e+30 }
 0x323   : > { %v2136_v55 = vmax.f32 %v4745_v31, %v4749_v44 }
 0x325   : > { %2137 = vmax.xlane.f32.xlu1 %v2136_v55 }
 0x32a   : > { %v4793_v52 = vpop.xlane.xlu0 %2113 }
 0x32b   : > { %v2160_v6 = vsub.f32 %v4654_v5, %v4793_v52  ;;  %v2161_v41 = vsub.f32 %v4658_v30, %v4793_v52 }
 0x32d   : > { %v2192_v17 = vmul.f32 1.442695, %v2160_v6  ;;  %v2194_v21 = vmul.f32 1.442695, %v2161_v41 }
 0x32e   : > { %v4799_v36 = vpop.xlane.xlu1 %2116 }
 0x32f   : > { %2938 = vpow2.f32 %v2192_v17  ;;  %v2162_v26 = vsub.f32 %v4665_v59, %v4799_v36 }
 0x330   : > { %2940 = vpow2.f32 %v2194_v21 }
 0x332   : > { %v4801_v10 = vpop.xlane.xlu0 %2119 }
 0x333   : > { %v2164_v49 = vsub.f32 %v4676_v23, %v4801_v10  ;;  %v2165_v42 = vsub.f32 %v4680_v40, %v4801_v10 }
 0x335   : > { %v2200_v1 = vmul.f32 1.442695, %v2164_v49  ;;  %v2202_v54 = vmul.f32 1.442695, %v2165_v42 }
 0x337   : > { %2942 = vpow2.f32 %v2200_v1 }
 0x338   : > { %2944 = vpow2.f32 %v2202_v54 }
 0x348   : > { %v2037_v34 = vpop.f32.mrf.mxu1 }
 0x349   : > { %v4755_v43 = vadd.f32 %v2037_v34, %v4649_v13  ;;  %v4818_v34 = vpop.xlane.xlu0 %2122 }
 0x34a   : > { %v2039_v39 = vpop.f32.mrf.mxu1  ;;  %v2167_v49 = vsub.f32 %v4691_v9, %v4818_v34 }
 0x34b   : > { %v2040_v46 = vadd.f32 %v2039_v39, %v4647_v12 }
 0x34d   : > { %v4759_v45 = vsel %vm2079_vm0, %v2040_v46, -1e+30 }
 0x34e   : > { %v2139_v32 = vmax.f32 %v4755_v43, %v4759_v45 }
 0x350   : > { %2140 = vmax.xlane.f32.xlu0 %v2139_v32 }
 0x352   : > { %v4807_v24 = vpop.xlane.xlu1 %2125 }
 0x353   : > { %v2168_v37 = vsub.f32 %v4698_v20, %v4807_v24  ;;  %v2169_v27 = vsub.f32 %v4702_v51, %v4807_v24 }
 0x355   : > { %v2208_v39 = vmul.f32 1.442695, %v2168_v37 }
 0x357   : > { %2946 = vpow2.f32 %v2208_v39 }
 0x35e   : > { %v4845_v21 = vpop.xlane.xlu0 %2128 }
 0x361   : > { %v2043_v25 = vpop.f32.mrf.mxu1 }
 0x362   : > { %v4765_v47 = vadd.f32 %v2043_v25, %v4649_v13  ;;  %v2210_v25 = vmul.f32 1.442695, %v2169_v27  ;;  %v2939_v27 = vpop.eup %2938 }
 0x363   : > { %v2045_v53 = vpop.f32.mrf.mxu1  ;;  %v2941_v39 = vpop.eup %2940 }
 0x364   : > { %v2046_v22 = vadd.f32 %v2045_v53, %v4647_v12  ;;  %2948 = vpow2.f32 %v2210_v25  ;;  %v2171_v25 = vsub.f32 %v4712_v28, %v4845_v21 }
 0x366   : > { %v4769_v19 = vsel %vm2079_vm0, %v2046_v22, -1e+30 }
 0x367   : > { %v2142_v61 = vmax.f32 %v4765_v47, %v4769_v19 }
 0x369   : > { %2143 = vmax.xlane.f32.xlu1 %v2142_v61 }
 0x36d   : > { %v2049_v18 = vpop.f32.mrf.mxu1 }
 0x36e   : > { %v4775_v16 = vadd.f32 %v2049_v18, %v4649_v13  ;;  %v2163_v18 = vsub.f32 %v4669_v3, %v4799_v36 }
 0x36f   : > { %v2051_v4 = vpop.f32.mrf.mxu1 }
 0x370   : > { %v2052_v33 = vadd.f32 %v2051_v4, %v4647_v12  ;;  %v2198_v17 = vmul.f32 1.442695, %v2163_v18  ;;  %v2943_v18 = vpop.eup %2942 }
 0x372   : > { %v4779_v62 = vsel %vm2079_vm0, %v2052_v33, -1e+30  ;;  %v2196_v33 = vmul.f32 1.442695, %v2162_v26 }
 0x373   : > { %v2145_v56 = vmax.f32 %v4775_v16, %v4779_v62 }
 0x374   : > { %2950 = vpow2.f32 %v2196_v33 }
 0x375   : > { %2146 = vmax.xlane.f32.xlu0 %v2145_v56  ;;  %v2166_v56 = vsub.f32 %v4687_v29, %v4818_v34 }
 0x377   : > { %v2204_v1 = vmul.f32 1.442695, %v2166_v56  ;;  %v2256_v56 = vadd.f32 %v2941_v39, %v2939_v27 }
 0x389   : > { %v4813_v7 = vpop.xlane.xlu1 %2131 }
 0x38a   : > { %v2172_v46 = vsub.f32 %v4724_v63, %v4813_v7  ;;  %v2173_v53 = vsub.f32 %v4728_v57, %v4813_v7 }
 0x398   : > { %v2055_v35 = vpop.f32.mrf.mxu1 }
 0x399   : > { %v4785_v14 = vadd.f32 %v2055_v35, %v4649_v13 }
 0x39a   : > { %v2057_v0 = vpop.f32.mrf.mxu1 }
 0x39b   : > { %v2058_v60 = vadd.f32 %v2057_v0, %v4647_v12  ;;  %v2216_v0 = vmul.f32 1.442695, %v2172_v46  ;;  %v2206_v46 = vmul.f32 1.442695, %v2167_v49 }
 0x39d   : > { %v4789_v48 = vsel %vm2079_vm0, %v2058_v60, -1e+30  ;;  %2952 = vpow2.f32 %v2216_v0  ;;  %v2214_v0 = vmul.f32 1.442695, %v2171_v25 }
 0x39e   : > { %v2148_v58 = vmax.f32 %v4785_v14, %v4789_v48 }
 0x3a0   : > { %2149 = vmax.xlane.f32.xlu1 %v2148_v58  ;;  %v2218_v58 = vmul.f32 1.442695, %v2173_v53 }
 0x3a2   : > { %2954 = vpow2.f32 %v2218_v58  ;;  %v4861_v53 = vpop.xlane.xlu0 %2134 }
 0x3a3   : > { %2956 = vpow2.f32 %v2198_v17  ;;  %v2174_v33 = vsub.f32 %v4735_v11, %v4861_v53 }
 0x3a4   : > { %2958 = vpow2.f32 %v2204_v1 }
 0x3ac   : > { %v2061_v38 = vpop.f32.mrf.mxu1 }
 0x3ad   : > { %v4823_v32 = vadd.f32 %v2061_v38, %v4649_v13 }
 0x3ae   : > { %v2063_v8 = vpop.f32.mrf.mxu1  ;;  %v4831_v61 = vpop.xlane.xlu1 %2137 }
 0x3af   : > { %v2064_v55 = vadd.f32 %v2063_v8, %v4647_v12  ;;  %v2176_v60 = vsub.f32 %v4745_v31, %v4831_v61  ;;  %v2177_v6 = vsub.f32 %v4749_v44, %v4831_v61  ;;  %v2170_v8 = vsub.f32 %v4708_v2, %v4845_v21 }
 0x3b1   : > { %v4829_v22 = vsel %vm2079_vm0, %v2064_v55, -1e+30  ;;  %v2224_v38 = vmul.f32 1.442695, %v2176_v60  ;;  %v2226_v26 = vmul.f32 1.442695, %v2177_v6  ;;  %v2175_v60 = vsub.f32 %v4739_v15, %v4861_v53 }
 0x3b2   : > { %v2151_v4 = vmax.f32 %v4823_v32, %v4829_v22 }
 0x3b3   : > { %v2067_v35 = vpop.f32.mrf.mxu1  ;;  %2960 = vpow2.f32 %v2224_v38 }
 0x3b4   : > { %2152 = vmax.xlane.f32.xlu0 %v2151_v4  ;;  %v4849_v37 = vadd.f32 %v2067_v35, %v4649_v13  ;;  %v2212_v4 = vmul.f32 1.442695, %v2170_v8  ;;  %2962 = vpow2.f32 %v2226_v26  ;;  %v2945_v35 = vpop.eup %2944 }
 0x3b5   : > { %v2069_v41 = vpop.f32.mrf.mxu1  ;;  %2964 = vpow2.f32 %v2206_v46  ;;  %v2947_v6 = vpop.eup %2946  ;;  %v2262_v17 = vadd.f32 %v2945_v35, %v2943_v18 }
 0x3b6   : > { %v2070_v42 = vadd.f32 %v2069_v41, %v4647_v12  ;;  %2966 = vpow2.f32 %v2212_v4  ;;  %v2220_v41 = vmul.f32 1.442695, %v2174_v33  ;;  %v2949_v49 = vpop.eup %2948 }
 0x3b7   : > { %2968 = vpow2.f32 %v2214_v0  ;;  %v2951_v27 = vpop.eup %2950  ;;  %v2268_v39 = vadd.f32 %v2949_v49, %v2947_v6 }
 0x3b8   : > { %v4853_v54 = vsel %vm2079_vm0, %v2070_v42, -1e+30  ;;  %v2222_v42 = vmul.f32 1.442695, %v2175_v60  ;;  %v2953_v26 = vpop.eup %2952  ;;  %2970 = vpow2.f32 %v2220_v41 }
 0x3b9   : > { %v2154_v55 = vmax.f32 %v4849_v37, %v4853_v54  ;;  %v2955_v46 = vpop.eup %2954 }
 0x3ba   : > { %2972 = vpow2.f32 %v2222_v42  ;;  %v2957_v18 = vpop.eup %2956  ;;  %v2274_v33 = vadd.f32 %v2955_v46, %v2953_v26 }
 0x3bb   : > { %2155 = vmax.xlane.f32.xlu1 %v2154_v55 }
 0x3bf   : > { %2257 = vadd.xlane.f32.xlu1 %v2256_v56  ;;  %v2259_v56 = vadd.f32 %v2957_v18, %v2951_v27 }
 0x3c0   : > { %v2073_v58 = vpop.f32.mrf.mxu1 }
 0x3c1   : > { %v4869_v8 = vadd.f32 %v2073_v58, %v4649_v13 }
 0x3c2   : > { %v2075_v1 = vpop.f32.mrf.mxu1 }
 0x3c3   : > { %v2076_v38 = vadd.f32 %v2075_v1, %v4647_v12  ;;  %2263 = vadd.xlane.f32.xlu1 %v2262_v17  ;;  %v2959_v12 = vpop.eup %2958 }
 0x3c4   : > { %v2961_v4 = vpop.eup %2960 }
 0x3c5   : > { %v4873_v55 = vsel %vm2079_vm0, %v2076_v38, -1e+30  ;;  %v2963_v13 = vpop.eup %2962 }
 0x3c6   : > { %v2157_v25 = vmax.f32 %v4869_v8, %v4873_v55  ;;  %v2965_v35 = vpop.eup %2964  ;;  %v2280_v50 = vadd.f32 %v2963_v13, %v2961_v4 }
 0x3c7   : > { %2269 = vadd.xlane.f32.xlu1 %v2268_v39  ;;  %v2967_v0 = vpop.eup %2966  ;;  %v2265_v60 = vadd.f32 %v2965_v35, %v2959_v12 }
 0x3c8   : > { %2158 = vmax.xlane.f32.xlu0 %v2157_v25  ;;  %v2969_v58 = vpop.eup %2968 }
 0x3c9   : > { %v2971_v6 = vpop.eup %2970  ;;  %v2271_v41 = vadd.f32 %v2969_v58, %v2967_v0 }
 0x3ca   : > { %v2973_v17 = vpop.eup %2972 }
 0x3cb   : > { %2275 = vadd.xlane.f32.xlu1 %v2274_v33  ;;  %v2277_v49 = vadd.f32 %v2973_v17, %v2971_v6 }
 0x3cc   : > { %2260 = vadd.xlane.f32.xlu0 %v2259_v56 }
 0x3cf   : > { %2281 = vadd.xlane.f32.xlu1 %v2280_v50 }
 0x3d0   : > { %2266 = vadd.xlane.f32.xlu0 %v2265_v60 }
 0x3d4   : > { %2272 = vadd.xlane.f32.xlu0 %v2271_v41 }
 0x3d8   : > { %2278 = vadd.xlane.f32.xlu0 %v2277_v49 }
 0x3d9   : > { %v4877_v42 = vpop.xlane.xlu0 %2140 }
 0x3da   : > { %v2178_v1 = vsub.f32 %v4755_v43, %v4877_v42  ;;  %v2179_v38 = vsub.f32 %v4759_v45, %v4877_v42 }
 0x3dc   : > { %v2228_v27 = vmul.f32 1.442695, %v2178_v1  ;;  %v2230_v26 = vmul.f32 1.442695, %v2179_v38 }
 0x3de   : > { %2974 = vpow2.f32 %v2228_v27 }
 0x3df   : > { %2976 = vpow2.f32 %v2230_v26 }
 0x3eb   : > { %v2975_v39 = vpop.eup %2974 }
 0x3ec   : > { %v2977_v46 = vpop.eup %2976 }
 0x3ed   : > { %v2283_v25 = vadd.f32 %v2977_v46, %v2975_v39 }
 0x3ef   : > { %2284 = vadd.xlane.f32.xlu0 %v2283_v25 }
 0x3f2   : > { %v4883_v18 = vpop.xlane.xlu1 %2143 }
 0x3f3   : > { %v2180_v12 = vsub.f32 %v4765_v47, %v4883_v18  ;;  %v2181_v4 = vsub.f32 %v4769_v19, %v4883_v18 }
 0x3f5   : > { %v2232_v33 = vmul.f32 1.442695, %v2180_v12  ;;  %v2234_v13 = vmul.f32 1.442695, %v2181_v4 }
 0x3f7   : > { %2978 = vpow2.f32 %v2232_v33 }
 0x3f8   : > { %2980 = vpow2.f32 %v2234_v13 }
 0x3fe   : > { %v4889_v56 = vpop.xlane.xlu0 %2146 }
 0x3ff   : > { %v2182_v35 = vsub.f32 %v4775_v16, %v4889_v56  ;;  %v2183_v50 = vsub.f32 %v4779_v62, %v4889_v56 }
 0x401   : > { %v2236_v0 = vmul.f32 1.442695, %v2182_v35  ;;  %v2238_v60 = vmul.f32 1.442695, %v2183_v50 }
 0x403   : > { %2982 = vpow2.f32 %v2236_v0 }
 0x404   : > { %v2979_v58 = vpop.eup %2978  ;;  %2984 = vpow2.f32 %v2238_v60 }
 0x405   : > { %v2981_v6 = vpop.eup %2980 }
 0x406   : > { %v2286_v41 = vadd.f32 %v2981_v6, %v2979_v58 }
 0x408   : > { %2287 = vadd.xlane.f32.xlu1 %v2286_v41 }
 0x410   : > { %v2983_v17 = vpop.eup %2982 }
 0x411   : > { %v2985_v49 = vpop.eup %2984 }
 0x412   : > { %v2289_v1 = vadd.f32 %v2985_v49, %v2983_v17 }
 0x414   : > { %2290 = vadd.xlane.f32.xlu0 %v2289_v1 }
 0x429   : > { %v4895_v38 = vpop.xlane.xlu1 %2149 }
 0x42a   : > { %v2184_v27 = vsub.f32 %v4785_v14, %v4895_v38  ;;  %v2185_v26 = vsub.f32 %v4789_v48, %v4895_v38 }
 0x42c   : > { %v2240_v39 = vmul.f32 1.442695, %v2184_v27  ;;  %v2242_v46 = vmul.f32 1.442695, %v2185_v26 }
 0x42e   : > { %2986 = vpow2.f32 %v2240_v39 }
 0x42f   : > { %2988 = vpow2.f32 %v2242_v46 }
 0x43b   : > { %v2987_v25 = vpop.eup %2986 }
 0x43c   : > { %v2989_v12 = vpop.eup %2988 }
 0x43d   : > { %v4901_v4 = vpop.xlane.xlu0 %2152  ;;  %v2292_v33 = vadd.f32 %v2989_v12, %v2987_v25 }
 0x43e   : > { %v2186_v13 = vsub.f32 %v4823_v32, %v4901_v4  ;;  %v2187_v35 = vsub.f32 %v4829_v22, %v4901_v4 }
 0x43f   : > { %2293 = vadd.xlane.f32.xlu1 %v2292_v33 }
 0x440   : > { %v2244_v50 = vmul.f32 1.442695, %v2186_v13  ;;  %v2246_v0 = vmul.f32 1.442695, %v2187_v35 }
 0x442   : > { %2990 = vpow2.f32 %v2244_v50 }
 0x443   : > { %2992 = vpow2.f32 %v2246_v0 }
 0x444   : > { %v4907_v60 = vpop.xlane.xlu1 %2155 }
 0x445   : > { %v2188_v58 = vsub.f32 %v4849_v37, %v4907_v60  ;;  %v2189_v6 = vsub.f32 %v4853_v54, %v4907_v60 }
 0x447   : > { %v2248_v41 = vmul.f32 1.442695, %v2188_v58  ;;  %v2250_v17 = vmul.f32 1.442695, %v2189_v6 }
 0x448   : > { %v2258_v49 = vpop.xlane.xlu1 %2257 }
 0x449   : > { %2994 = vpow2.f32 %v2248_v41 }
 0x44a   : > { %2996 = vpow2.f32 %v2250_v17 }
 0x44b   : > { %2998 = vlog2.f32 %v2258_v49 }
 0x44c   : > { %v2264_v1 = vpop.xlane.xlu1 %2263 }
 0x44d   : > { %3000 = vlog2.f32 %v2264_v1 }
 0x44f   : > { %v2991_v27 = vpop.eup %2990 }
 0x450   : > { %v2993_v26 = vpop.eup %2992  ;;  %v2270_v39 = vpop.xlane.xlu1 %2269 }
 0x451   : > { %3002 = vlog2.f32 %v2270_v39  ;;  %v4913_v46 = vpop.xlane.xlu0 %2158  ;;  %v2295_v25 = vadd.f32 %v2993_v26, %v2991_v27 }
 0x452   : > { %v2190_v12 = vsub.f32 %v4869_v8, %v4913_v46  ;;  %v2191_v33 = vsub.f32 %v4873_v55, %v4913_v46 }
 0x453   : > { %2296 = vadd.xlane.f32.xlu0 %v2295_v25 }
 0x454   : > { %v2252_v13 = vmul.f32 1.442695, %v2190_v12  ;;  %v2254_v35 = vmul.f32 1.442695, %v2191_v33  ;;  %v2276_v50 = vpop.xlane.xlu1 %2275 }
 0x455   : > { %3004 = vlog2.f32 %v2276_v50  ;;  %v2261_v0 = vpop.xlane.xlu0 %2260 }
 0x456   : > { %v2995_v58 = vpop.eup %2994  ;;  %3006 = vpow2.f32 %v2252_v13 }
 0x457   : > { %v2997_v6 = vpop.eup %2996  ;;  %3008 = vpow2.f32 %v2254_v35 }
 0x458   : > { %v2999_v41 = vpop.eup %2998  ;;  %3010 = vlog2.f32 %v2261_v0  ;;  %v2282_v17 = vpop.xlane.xlu1 %2281  ;;  %v2298_v49 = vadd.f32 %v2997_v6, %v2995_v58 }
 0x459   : > { %v2305_v1 = vmul.f32 0.6931472, %v2999_v41  ;;  %3012 = vlog2.f32 %v2282_v17  ;;  %v2267_v27 = vpop.xlane.xlu0 %2266 }
 0x45a   : > { %v3001_v26 = vpop.eup %3000  ;;  %3014 = vlog2.f32 %v2267_v27  ;;  %2299 = vadd.xlane.f32.xlu1 %v2298_v49 }
 0x45b   : > { %v2336_v39 = vadd.f32 %v2305_v1, %v4793_v52  ;;  %v2309_v25 = vmul.f32 0.6931472, %v3001_v26 }
 0x45d   : > { %v2352_v12 = vsub.f32 %v4654_v5, %v2336_v39  ;;  %v2353_v33 = vsub.f32 %v4658_v30, %v2336_v39  ;;  %v2338_v13 = vadd.f32 %v2309_v25, %v4801_v10  ;;  %v2273_v35 = vpop.xlane.xlu0 %2272 }
 0x45e   : > { %v3003_v50 = vpop.eup %3002  ;;  %3016 = vlog2.f32 %v2273_v35 }
 0x45f   : > { %2384 = vst [vmem:[%s4924_s27] sm:$0xff] %v2352_v12  ;;  %2385 = vst [vmem:[%s4924_s27 + $0x8] sm:$0xff] %v2353_v33  ;;  %v2356_v52 = vsub.f32 %v4676_v23, %v2338_v13  ;;  %v2357_v0 = vsub.f32 %v4680_v40, %v2338_v13  ;;  %v2313_v58 = vmul.f32 0.6931472, %v3003_v50 }
 0x461   : > { %2388 = vst [vmem:[%s4924_s27 + $0x20] sm:$0xff] %v2356_v52  ;;  %2389 = vst [vmem:[%s4924_s27 + $0x28] sm:$0xff] %v2357_v0  ;;  %v2340_v5 = vadd.f32 %v2313_v58, %v4807_v24  ;;  %v2279_v6 = vpop.xlane.xlu0 %2278 }
 0x462   : > { %v3005_v30 = vpop.eup %3004  ;;  %3018 = vlog2.f32 %v2279_v6 }
 0x463   : > { %v3007_v10 = vpop.eup %3006  ;;  %v2360_v41 = vsub.f32 %v4698_v20, %v2340_v5  ;;  %v2361_v17 = vsub.f32 %v4702_v51, %v2340_v5  ;;  %v2317_v49 = vmul.f32 0.6931472, %v3005_v30 }
 0x464   : > { %v3009_v1 = vpop.eup %3008 }
 0x465   : > { %v3011_v23 = vpop.eup %3010  ;;  %2392 = vst [vmem:[%s4924_s27 + $0x40] sm:$0xff] %v2360_v41  ;;  %2393 = vst [vmem:[%s4924_s27 + $0x48] sm:$0xff] %v2361_v17  ;;  %v2342_v40 = vadd.f32 %v2317_v49, %v4813_v7  ;;  %v2301_v27 = vadd.f32 %v3009_v1, %v3007_v10 }
 0x466   : > { %v3013_v26 = vpop.eup %3012  ;;  %v2307_v24 = vmul.f32 0.6931472, %v3011_v23 }
 0x467   : > { %v3015_v39 = vpop.eup %3014  ;;  %v2364_v25 = vsub.f32 %v4724_v63, %v2342_v40  ;;  %v2365_v20 = vsub.f32 %v4728_v57, %v2342_v40  ;;  %v2321_v51 = vmul.f32 0.6931472, %v3013_v26  ;;  %2302 = vadd.xlane.f32.xlu0 %v2301_v27 }
 0x468   : > { %v2337_v12 = vadd.f32 %v2307_v24, %v4799_v36  ;;  %v2311_v33 = vmul.f32 0.6931472, %v3015_v39 }
 0x469   : > { %2396 = vst [vmem:[%s4924_s27 + $0x60] sm:$0xff] %v2364_v25  ;;  %2397 = vst [vmem:[%s4924_s27 + $0x68] sm:$0xff] %v2365_v20  ;;  %v2344_v7 = vadd.f32 %v2321_v51, %v4831_v61 }
 0x46a   : > { %v2354_v13 = vsub.f32 %v4665_v59, %v2337_v12  ;;  %v2355_v63 = vsub.f32 %v4669_v3, %v2337_v12  ;;  %v2339_v35 = vadd.f32 %v2311_v33, %v4818_v34 }
 0x46b   : > { %v3017_v57 = vpop.eup %3016  ;;  %v2368_v50 = vsub.f32 %v4745_v31, %v2344_v7  ;;  %v2369_v36 = vsub.f32 %v4749_v44, %v2344_v7 }
 0x46c   : > { %2386 = vst [vmem:[%s4924_s27 + $0x10] sm:$0xff] %v2354_v13  ;;  %2387 = vst [vmem:[%s4924_s27 + $0x18] sm:$0xff] %v2355_v63  ;;  %v2358_v52 = vsub.f32 %v4687_v29, %v2339_v35  ;;  %v2359_v0 = vsub.f32 %v4691_v9, %v2339_v35  ;;  %v2315_v61 = vmul.f32 0.6931472, %v3017_v57 }
 0x46d   : > { %2400 = vst [vmem:[%s4924_s27 + $0x80] sm:$0xff] %v2368_v50  ;;  %2401 = vst [vmem:[%s4924_s27 + $0x88] sm:$0xff] %v2369_v36 }
 0x46e   : > { %2390 = vst [vmem:[%s4924_s27 + $0x30] sm:$0xff] %v2358_v52  ;;  %2391 = vst [vmem:[%s4924_s27 + $0x38] sm:$0xff] %v2359_v0  ;;  %v2341_v59 = vadd.f32 %v2315_v61, %v4845_v21 }
 0x46f   : > { %v3019_v3 = vpop.eup %3018 }
 0x470   : > { %v2362_v31 = vsub.f32 %v4708_v2, %v2341_v59  ;;  %v2363_v44 = vsub.f32 %v4712_v28, %v2341_v59  ;;  %v2319_v34 = vmul.f32 0.6931472, %v3019_v3 }
 0x472   : > { %2394 = vst [vmem:[%s4924_s27 + $0x50] sm:$0xff] %v2362_v31  ;;  %2395 = vst [vmem:[%s4924_s27 + $0x58] sm:$0xff] %v2363_v44  ;;  %v2343_v29 = vadd.f32 %v2319_v34, %v4861_v53 }
 0x474   : > { %v2366_v9 = vsub.f32 %v4735_v11, %v2343_v29  ;;  %v2367_v58 = vsub.f32 %v4739_v15, %v2343_v29 }
 0x476   : > { %2398 = vst [vmem:[%s4924_s27 + $0x70] sm:$0xff] %v2366_v9  ;;  %2399 = vst [vmem:[%s4924_s27 + $0x78] sm:$0xff] %v2367_v58 }
 0x478   : > { %v2285_v5 = vpop.xlane.xlu0 %2284 }
 0x479   : > { %3020 = vlog2.f32 %v2285_v5 }
 0x486   : > { %v3021_v21 = vpop.eup %3020 }
 0x487   : > { %v2323_v2 = vmul.f32 0.6931472, %v3021_v21 }
 0x489   : > { %v2345_v28 = vadd.f32 %v2323_v2, %v4877_v42 }
 0x48b   : > { %v2370_v6 = vsub.f32 %v4755_v43, %v2345_v28  ;;  %v2371_v30 = vsub.f32 %v4759_v45, %v2345_v28 }
 0x48d   : > { %2402 = vst [vmem:[%s4924_s27 + $0x90] sm:$0xff] %v2370_v6  ;;  %2403 = vst [vmem:[%s4924_s27 + $0x98] sm:$0xff] %v2371_v30 }
 0x491   : > { %v2288_v53 = vpop.xlane.xlu1 %2287 }
 0x492   : > { %3022 = vlog2.f32 %v2288_v53 }
 0x49d   : > { %v2291_v11 = vpop.xlane.xlu0 %2290 }
 0x49e   : > { %3024 = vlog2.f32 %v2291_v11 }
 0x49f   : > { %v3023_v15 = vpop.eup %3022 }
 0x4a0   : > { %v2325_v10 = vmul.f32 0.6931472, %v3023_v15 }
 0x4a2   : > { %v2346_v41 = vadd.f32 %v2325_v10, %v4883_v18 }
 0x4a4   : > { %v2372_v17 = vsub.f32 %v4765_v47, %v2346_v41  ;;  %v2373_v42 = vsub.f32 %v4769_v19, %v2346_v41 }
 0x4a6   : > { %2404 = vst [vmem:[%s4924_s27 + $0xa0] sm:$0xff] %v2372_v17  ;;  %2405 = vst [vmem:[%s4924_s27 + $0xa8] sm:$0xff] %v2373_v42 }
 0x4ab   : > { %v3025_v43 = vpop.eup %3024 }
 0x4ac   : > { %v2327_v45 = vmul.f32 0.6931472, %v3025_v43 }
 0x4ae   : > { %v2347_v49 = vadd.f32 %v2327_v45, %v4889_v56 }
 0x4b0   : > { %v2374_v1 = vsub.f32 %v4775_v16, %v2347_v49  ;;  %v2375_v23 = vsub.f32 %v4779_v62, %v2347_v49 }
 0x4b2   : > { %2406 = vst [vmem:[%s4924_s27 + $0xb0] sm:$0xff] %v2374_v1  ;;  %2407 = vst [vmem:[%s4924_s27 + $0xb8] sm:$0xff] %v2375_v23 }
 0x4c8   : > { %v2294_v40 = vpop.xlane.xlu1 %2293 }
 0x4c9   : > { %3026 = vlog2.f32 %v2294_v40 }
 0x4d6   : > { %v3027_v18 = vpop.eup %3026 }
 0x4d7   : > { %v2329_v47 = vmul.f32 0.6931472, %v3027_v18 }
 0x4d9   : > { %v2348_v19 = vadd.f32 %v2329_v47, %v4895_v38 }
 0x4db   : > { %v2376_v27 = vsub.f32 %v4785_v14, %v2348_v19  ;;  %v2377_v26 = vsub.f32 %v4789_v48, %v2348_v19 }
 0x4dc   : > { %v2297_v24 = vpop.xlane.xlu0 %2296 }
 0x4dd   : > { %2408 = vst [vmem:[%s4924_s27 + $0xc0] sm:$0xff] %v2376_v27  ;;  %2409 = vst [vmem:[%s4924_s27 + $0xc8] sm:$0xff] %v2377_v26  ;;  %3028 = vlog2.f32 %v2297_v24 }
 0x4e3   : > { %v2300_v16 = vpop.xlane.xlu1 %2299 }
 0x4e4   : > { %3030 = vlog2.f32 %v2300_v16 }
 0x4ea   : > { %v3029_v62 = vpop.eup %3028 }
 0x4eb   : > { %v2331_v56 = vmul.f32 0.6931472, %v3029_v62 }
 0x4ed   : > { %v2349_v39 = vadd.f32 %v2331_v56, %v4901_v4 }
 0x4ef   : > { %v2378_v38 = vsub.f32 %v4823_v32, %v2349_v39  ;;  %v2379_v25 = vsub.f32 %v4829_v22, %v2349_v39 }
 0x4f0   : > { %v2303_v14 = vpop.xlane.xlu0 %2302 }
 0x4f1   : > { %v3031_v20 = vpop.eup %3030  ;;  %2410 = vst [vmem:[%s4924_s27 + $0xd0] sm:$0xff] %v2378_v38  ;;  %2411 = vst [vmem:[%s4924_s27 + $0xd8] sm:$0xff] %v2379_v25  ;;  %3032 = vlog2.f32 %v2303_v14 }
 0x4f2   : > { %v2333_v48 = vmul.f32 0.6931472, %v3031_v20 }
 0x4f4   : > { %v2350_v51 = vadd.f32 %v2333_v48, %v4907_v60 }
 0x4f6   : > { %v2380_v12 = vsub.f32 %v4849_v37, %v2350_v51  ;;  %v2381_v33 = vsub.f32 %v4853_v54, %v2350_v51 }
 0x4f8   : > { %2412 = vst [vmem:[%s4924_s27 + $0xe0] sm:$0xff] %v2380_v12  ;;  %2413 = vst [vmem:[%s4924_s27 + $0xe8] sm:$0xff] %v2381_v33 }
 0x4fe   : > { %v3033_v4 = vpop.eup %3032 }
 0x4ff   : > { %v2335_v32 = vmul.f32 0.6931472, %v3033_v4 }
 0x501   : > { %v2351_v22 = vadd.f32 %v2335_v32, %v4913_v46 }
 0x503   : > { %v2382_v7 = vsub.f32 %v4869_v8, %v2351_v22  ;;  %v2383_v13 = vsub.f32 %v4873_v55, %v2351_v22 }
 0x505   : > { %2414 = vst [vmem:[%s4924_s27 + $0xf0] sm:$0xff] %v2382_v7  ;;  %2415 = vst [vmem:[%s4924_s27 + $0xf8] sm:$0xff] %v2383_v13 }
 0x506 PF: > { %s15_s18 = sadd.s32 1, %s3047_s18  }
 0x507   : > { %p12_p4 = scmp.ge.s32.totalorder %s15_s18, 4  }
 0x509   :  { %14 = sbr.rel (!%p12_p4) target bundleno = 1 (0x1), region = 70 }

</bundles_post_ra>
